<compile_context>
chip_gen: v7x
topology: tpu7x:2x2x1
jax: 0.10.0
libtpu: 0.0.40
codegen_flags: <defaults>
</compile_context>

<pallas_src>
import math
import jax
import jax.numpy as jnp
from jax.experimental import pallas as pl
from jax.experimental.pallas import tpu as pltpu

D_MODEL = 32
N_HEADS = 4
D_K = D_MODEL // N_HEADS
EPS = 1e-6
NEG_INF = -1e30  # finite "minus infinity": avoids NaN on fully-masked rows


# ---------------------------------------------------------------- kernel -----

def _decoder_layer_kernel(
    x_ref, mem_ref, trg_amask_ref, src_amask_ref, hsel_ref,
    ln0_g_ref, ln0_b_ref, wq0_ref, bq0_ref, wk0_ref, bk0_ref, wv0_ref, bv0_ref, wo0_ref, bo0_ref,
    ln1_g_ref, ln1_b_ref, wq1_ref, bq1_ref, wk1_ref, bk1_ref, wv1_ref, bv1_ref, wo1_ref, bo1_ref,
    ln2_g_ref, ln2_b_ref, w1_ref, b1_ref, w2_ref, b2_ref,
    o_ref,
):
    BS, D = x_ref.shape            # (B*S, D) token slab
    S = hsel_ref.shape[0] // N_HEADS
    B = BS // S
    Sm = mem_ref.shape[0] // B

    x = x_ref[...].astype(jnp.float32)        # (B*S, D)
    mem = mem_ref[...].astype(jnp.float32)    # (B*Sm, D)
    hsel = hsel_ref[...]                      # (H*S, D): row h*S+q keeps head h's lanes

    def layer_norm(v, g_ref, b_ref):
        mu = jnp.mean(v, axis=-1, keepdims=True)
        var = jnp.mean((v - mu) ** 2, axis=-1, keepdims=True)
        return (v - mu) * jax.lax.rsqrt(var + EPS) * g_ref[...] + b_ref[...]

    def mha(xq, xkv, skv, amask,
            wq_ref, bq_ref, wk_ref, bk_ref, wv_ref, bv_ref, wo_ref, bo_ref):
        # xq: (B*S, D)   xkv: (B*skv, D)   amask: (B, H*S, skv) additive f32
        # 1/sqrt(d_k) is pre-folded into wq/bq by the wrapper.
        q2 = jnp.dot(xq, wq_ref[...], preferred_element_type=jnp.float32) + bq_ref[...]
        k2 = jnp.dot(xkv, wk_ref[...], preferred_element_type=jnp.float32) + bk_ref[...]
        v2 = jnp.dot(xkv, wv_ref[...], preferred_element_type=jnp.float32) + bv_ref[...]

        q3 = q2.reshape(B, S, D)
        k3 = k2.reshape(B, skv, D)
        v3 = v2.reshape(B, skv, D)

        # Head-stacked queries: replicate along rows, zero all lanes but head h's.
        q_rep = jnp.concatenate([q3] * N_HEADS, axis=1)          # (B, H*S, D)
        qs = q_rep * hsel                                        # lane mask, no relayout

        # All heads' scores in ONE batched contraction (full D=32 contraction;
        # cross-head terms are killed by the zeroed query lanes).
        s = jnp.einsum('bqd,bkd->bqk', qs, k3,
                       preferred_element_type=jnp.float32)       # (B, H*S, skv)
        s = s + amask                                            # additive mask, added once
        m = jnp.max(s, axis=-1, keepdims=True)
        e = jnp.exp(s - m)
        w = e * pl.reciprocal(jnp.sum(e, axis=-1, keepdims=True), approx=False)

        # All heads' contexts in ONE batched contraction.
        c = jnp.einsum('bqk,bkd->bqd', w, v3,
                       preferred_element_type=jnp.float32)       # (B, H*S, D)
        c = c * hsel                                             # keep only head h's lanes
        ctx = c[:, 0:S, :]
        for h in range(1, N_HEADS):                              # 3 vreg adds, disjoint lanes
            ctx = ctx + c[:, h * S:(h + 1) * S, :]
        ctx = ctx.reshape(B * S, D)                              # head-major concat layout

        return jnp.dot(ctx, wo_ref[...], preferred_element_type=jnp.float32) + bo_ref[...]

    # sublayer 0: self-attention (dropout == identity)
    y = layer_norm(x, ln0_g_ref, ln0_b_ref)
    x = x + mha(y, y, S, trg_amask_ref[...],
                wq0_ref, bq0_ref, wk0_ref, bk0_ref, wv0_ref, bv0_ref, wo0_ref, bo0_ref)

    # sublayer 1: source attention
    y = layer_norm(x, ln1_g_ref, ln1_b_ref)
    x = x + mha(y, mem, Sm, src_amask_ref[...],
                wq1_ref, bq1_ref, wk1_ref, bk1_ref, wv1_ref, bv1_ref, wo1_ref, bo1_ref)

    # sublayer 2: position-wise feed-forward (hidden = 4*D = 128 lanes, lane-dense)
    y = layer_norm(x, ln2_g_ref, ln2_b_ref)
    h1 = jnp.dot(y, w1_ref[...], preferred_element_type=jnp.float32) + b1_ref[...]
    h1 = jnp.maximum(h1, 0.0)
    x = x + jnp.dot(h1, w2_ref[...], preferred_element_type=jnp.float32) + b2_ref[...]

    o_ref[...] = x.astype(o_ref.dtype)


# ---------------------------------------------------------------- wrapper ----

def decoder_layer(x, memory, src_mask, trg_mask, params):
    """x: (B, S, D); memory: (B, Sm, D); masks: (B|1, 1, Sq, Sk) bool, True == masked."""
    B, S, D = x.shape
    Sm = memory.shape[1]
    scale = 1.0 / math.sqrt(D_K)

    def pack_mha(p):
        # fold the 1/sqrt(d_k) score scale into the Q projection; K/V kept separate
        return (p["wq"] * scale, (p["bq"] * scale).reshape(1, D),
                p["wk"], p["bk"].reshape(1, D),
                p["wv"], p["bv"].reshape(1, D),
                p["wo"], p["bo"].reshape(1, D))

    sa = pack_mha(params["self_attn"])
    ca = pack_mha(params["src_attn"])

    # Additive f32 masks, pre-tiled over heads to match the head-stacked score
    # rows (row index = h*S + q).  True (masked) -> NEG_INF, else 0.
    def additive_mask(mask, sk):
        m = jnp.broadcast_to(mask, (B, 1, S, sk))[:, 0]
        add = jnp.where(m, jnp.float32(NEG_INF), jnp.float32(0.0))   # (B, S, sk)
        return jnp.tile(add, (1, N_HEADS, 1))                        # (B, H*S, sk)

    trg_add = additive_mask(trg_mask, S)
    src_add = additive_mask(src_mask, Sm)

    # Stacked head-lane selector: row h*S+q keeps lanes [h*D_K, (h+1)*D_K).
    lane = jnp.arange(D, dtype=jnp.int32)
    head = jnp.arange(N_HEADS, dtype=jnp.int32)
    hsel = (lane[None, :] // D_K == head[:, None]).astype(jnp.float32)   # (H, D)
    hsel = jnp.repeat(hsel, S, axis=0)                                   # (H*S, D)

    args = (
        x.reshape(B * S, D), memory.reshape(B * Sm, D), trg_add, src_add, hsel,
        params["ln0_g"].reshape(1, D), params["ln0_b"].reshape(1, D), *sa,
        params["ln1_g"].reshape(1, D), params["ln1_b"].reshape(1, D), *ca,
        params["ln2_g"].reshape(1, D), params["ln2_b"].reshape(1, D),
        params["ffn_w1"], params["ffn_b1"].reshape(1, -1),
        params["ffn_w2"], params["ffn_b2"].reshape(1, -1),
    )

    # Single fused kernel, no grid: everything (weights + activations, ~100 KB)
    # is explicitly VMEM-resident.  At B*S = 16 rows the kernel is launch-
    # latency bound, so a grid / megacore split would only add per-step cost.
    out2 = pl.pallas_call(
        _decoder_layer_kernel,
        out_shape=jax.ShapeDtypeStruct((B * S, D), x.dtype),
        in_specs=[pl.BlockSpec(memory_space=pltpu.MemorySpace.VMEM) for _ in args],
        out_specs=pl.BlockSpec(memory_space=pltpu.MemorySpace.VMEM),
        compiler_params=pltpu.CompilerParams(vmem_limit_bytes=32 * 1024 * 1024),
    )(*args)
    return out2.reshape(B, S, D)


# ---------------------------------------------------------------- params -----

def _xavier_uniform(key, fan_in, fan_out):
    a = math.sqrt(6.0 / (fan_in + fan_out))
    # stored as (in, out) so the kernel does x @ w directly
    return jax.random.uniform(key, (fan_in, fan_out), jnp.float32, -a, a)


def _mha_params(key):
    ks = jax.random.split(key, 4)
    return {
        "wq": _xavier_uniform(ks[0], D_MODEL, D_MODEL), "bq": jnp.zeros((D_MODEL,), jnp.float32),
        "wk": _xavier_uniform(ks[1], D_MODEL, D_MODEL), "bk": jnp.zeros((D_MODEL,), jnp.float32),
        "wv": _xavier_uniform(ks[2], D_MODEL, D_MODEL), "bv": jnp.zeros((D_MODEL,), jnp.float32),
        "wo": _xavier_uniform(ks[3], D_MODEL, D_MODEL), "bo": jnp.zeros((D_MODEL,), jnp.float32),
    }


def init_params(key):
    k_self, k_src, k_f1, k_f2 = jax.random.split(key, 4)
    return {
        "self_attn": _mha_params(k_self),
        "src_attn": _mha_params(k_src),
        "ffn_w1": _xavier_uniform(k_f1, D_MODEL, 4 * D_MODEL),
        "ffn_b1": jnp.zeros((4 * D_MODEL,), jnp.float32),
        "ffn_w2": _xavier_uniform(k_f2, 4 * D_MODEL, D_MODEL),
        "ffn_b2": jnp.zeros((D_MODEL,), jnp.float32),
        "ln0_g": jnp.ones((D_MODEL,), jnp.float32), "ln0_b": jnp.zeros((D_MODEL,), jnp.float32),
        "ln1_g": jnp.ones((D_MODEL,), jnp.float32), "ln1_b": jnp.zeros((D_MODEL,), jnp.float32),
        "ln2_g": jnp.ones((D_MODEL,), jnp.float32), "ln2_b": jnp.zeros((D_MODEL,), jnp.float32),
    }


# ---------------------------------------------------------------- main -------

if __name__ == "__main__":
    B, S_TRG, S_SRC = 2, 8, 8
    key = jax.random.PRNGKey(0)
    k_x, k_m, k_p = jax.random.split(key, 3)

    x = jax.random.normal(k_x, (B, S_TRG, D_MODEL), jnp.float32)
    memory = jax.random.normal(k_m, (B, S_SRC, D_MODEL), jnp.float32)

    # trg_mask: causal — True (masked) where key position > query position
    causal = jnp.triu(jnp.ones((S_TRG, S_TRG), jnp.bool_), k=1)
    trg_mask = jnp.broadcast_to(causal, (B, 1, S_TRG, S_TRG))
    # src_mask: nothing masked
    src_mask = jnp.zeros((B, 1, S_TRG, S_SRC), jnp.bool_)

    params = init_params(k_p)

    fwd = jax.jit(decoder_layer)
    out = fwd(x, memory, src_mask, trg_mask, params)
    out = jax.block_until_ready(out)
    assert out.shape == (B, S_TRG, D_MODEL)
    assert bool(jnp.all(jnp.isfinite(out)))
    print("KERNEL_OK")
</pallas_src>

<mosaic_0001>
module attributes {stable_mosaic.version = 11 : i64} {
  func.func @_decoder_layer_kernel(%arg0: memref<16x32xf32, #tpu.memory_space<vmem>>, %arg1: memref<16x32xf32, #tpu.memory_space<vmem>>, %arg2: memref<2x32x8xf32, #tpu.memory_space<vmem>>, %arg3: memref<2x32x8xf32, #tpu.memory_space<vmem>>, %arg4: memref<32x32xf32, #tpu.memory_space<vmem>>, %arg5: memref<1x32xf32, #tpu.memory_space<vmem>>, %arg6: memref<1x32xf32, #tpu.memory_space<vmem>>, %arg7: memref<32x32xf32, #tpu.memory_space<vmem>>, %arg8: memref<1x32xf32, #tpu.memory_space<vmem>>, %arg9: memref<32x32xf32, #tpu.memory_space<vmem>>, %arg10: memref<1x32xf32, #tpu.memory_space<vmem>>, %arg11: memref<32x32xf32, #tpu.memory_space<vmem>>, %arg12: memref<1x32xf32, #tpu.memory_space<vmem>>, %arg13: memref<32x32xf32, #tpu.memory_space<vmem>>, %arg14: memref<1x32xf32, #tpu.memory_space<vmem>>, %arg15: memref<1x32xf32, #tpu.memory_space<vmem>>, %arg16: memref<1x32xf32, #tpu.memory_space<vmem>>, %arg17: memref<32x32xf32, #tpu.memory_space<vmem>>, %arg18: memref<1x32xf32, #tpu.memory_space<vmem>>, %arg19: memref<32x32xf32, #tpu.memory_space<vmem>>, %arg20: memref<1x32xf32, #tpu.memory_space<vmem>>, %arg21: memref<32x32xf32, #tpu.memory_space<vmem>>, %arg22: memref<1x32xf32, #tpu.memory_space<vmem>>, %arg23: memref<32x32xf32, #tpu.memory_space<vmem>>, %arg24: memref<1x32xf32, #tpu.memory_space<vmem>>, %arg25: memref<1x32xf32, #tpu.memory_space<vmem>>, %arg26: memref<1x32xf32, #tpu.memory_space<vmem>>, %arg27: memref<32x128xf32, #tpu.memory_space<vmem>>, %arg28: memref<1x128xf32, #tpu.memory_space<vmem>>, %arg29: memref<128x32xf32, #tpu.memory_space<vmem>>, %arg30: memref<1x32xf32, #tpu.memory_space<vmem>>, %arg31: memref<16x32xf32, #tpu.memory_space<vmem>>) attributes {dimension_semantics = [], scalar_prefetch = 0 : i64, scratch_operands = 0 : i64, tpu.core_type = #tpu.core_type<tc>} {
    %c0 = arith.constant 0 : index
    %c0_0 = arith.constant 0 : index
    %0 = vector.load %arg0[%c0, %c0_0] : memref<16x32xf32, #tpu.memory_space<vmem>>, vector<16x32xf32>
    %c0_1 = arith.constant 0 : index
    %c0_2 = arith.constant 0 : index
    %1 = vector.load %arg1[%c0_1, %c0_2] : memref<16x32xf32, #tpu.memory_space<vmem>>, vector<16x32xf32>
    %c0_3 = arith.constant 0 : index
    %c0_4 = arith.constant 0 : index
    %2 = vector.load %arg4[%c0_3, %c0_4] : memref<32x32xf32, #tpu.memory_space<vmem>>, vector<32x32xf32>
    %cst = arith.constant dense<0.000000e+00> : vector<16xf32>
    %3 = vector.multi_reduction <add>, %0, %cst [1] : vector<16x32xf32> to vector<16xf32>
    %4 = vector.shape_cast %3 : vector<16xf32> to vector<16x1xf32>
    %cst_5 = arith.constant 3.200000e+01 : f32
    %5 = vector.broadcast %cst_5 : f32 to vector<16x1xf32>
    %6 = arith.divf %4, %5 : vector<16x1xf32>
    %7 = vector.broadcast %6 : vector<16x1xf32> to vector<16x32xf32>
    %8 = arith.subf %0, %7 : vector<16x32xf32>
    %9 = arith.mulf %8, %8 : vector<16x32xf32>
    %cst_6 = arith.constant dense<0.000000e+00> : vector<16xf32>
    %10 = vector.multi_reduction <add>, %9, %cst_6 [1] : vector<16x32xf32> to vector<16xf32>
    %11 = vector.shape_cast %10 : vector<16xf32> to vector<16x1xf32>
    %cst_7 = arith.constant 3.200000e+01 : f32
    %12 = vector.broadcast %cst_7 : f32 to vector<16x1xf32>
    %13 = arith.divf %11, %12 : vector<16x1xf32>
    %14 = vector.broadcast %6 : vector<16x1xf32> to vector<16x32xf32>
    %15 = arith.subf %0, %14 : vector<16x32xf32>
    %cst_8 = arith.constant 9.99999997E-7 : f32
    %16 = vector.broadcast %cst_8 : f32 to vector<16x1xf32>
    %17 = arith.addf %13, %16 : vector<16x1xf32>
    %18 = math.rsqrt %17 : vector<16x1xf32>
    %19 = vector.broadcast %18 : vector<16x1xf32> to vector<16x32xf32>
    %20 = arith.mulf %15, %19 : vector<16x32xf32>
    %c0_9 = arith.constant 0 : index
    %c0_10 = arith.constant 0 : index
    %21 = vector.load %arg5[%c0_9, %c0_10] : memref<1x32xf32, #tpu.memory_space<vmem>>, vector<1x32xf32>
    %22 = vector.broadcast %21 : vector<1x32xf32> to vector<16x32xf32>
    %23 = arith.mulf %20, %22 : vector<16x32xf32>
    %c0_11 = arith.constant 0 : index
    %c0_12 = arith.constant 0 : index
    %24 = vector.load %arg6[%c0_11, %c0_12] : memref<1x32xf32, #tpu.memory_space<vmem>>, vector<1x32xf32>
    %25 = vector.broadcast %24 : vector<1x32xf32> to vector<16x32xf32>
    %26 = arith.addf %23, %25 : vector<16x32xf32>
    %c0_13 = arith.constant 0 : index
    %c0_14 = arith.constant 0 : index
    %c0_15 = arith.constant 0 : index
    %27 = vector.load %arg2[%c0_13, %c0_14, %c0_15] : memref<2x32x8xf32, #tpu.memory_space<vmem>>, vector<2x32x8xf32>
    %c0_16 = arith.constant 0 : index
    %c0_17 = arith.constant 0 : index
    %28 = vector.load %arg7[%c0_16, %c0_17] : memref<32x32xf32, #tpu.memory_space<vmem>>, vector<32x32xf32>
    %cst_18 = arith.constant dense<0.000000e+00> : vector<16x32xf32>
    %29 = tpu.matmul %26, %28, %cst_18 {dimension_numbers = #tpu.dot_dimension_numbers<[1], [0], [0], [1], [0, 0, 1, 1], [], []>} : vector<16x32xf32>, vector<32x32xf32>, vector<16x32xf32> -> vector<16x32xf32>
    %c0_19 = arith.constant 0 : index
    %c0_20 = arith.constant 0 : index
    %30 = vector.load %arg8[%c0_19, %c0_20] : memref<1x32xf32, #tpu.memory_space<vmem>>, vector<1x32xf32>
    %31 = vector.broadcast %30 : vector<1x32xf32> to vector<16x32xf32>
    %32 = arith.addf %29, %31 : vector<16x32xf32>
    %c0_21 = arith.constant 0 : index
    %c0_22 = arith.constant 0 : index
    %33 = vector.load %arg9[%c0_21, %c0_22] : memref<32x32xf32, #tpu.memory_space<vmem>>, vector<32x32xf32>
    %cst_23 = arith.constant dense<0.000000e+00> : vector<16x32xf32>
    %34 = tpu.matmul %26, %33, %cst_23 {dimension_numbers = #tpu.dot_dimension_numbers<[1], [0], [0], [1], [0, 0, 1, 1], [], []>} : vector<16x32xf32>, vector<32x32xf32>, vector<16x32xf32> -> vector<16x32xf32>
    %c0_24 = arith.constant 0 : index
    %c0_25 = arith.constant 0 : index
    %35 = vector.load %arg10[%c0_24, %c0_25] : memref<1x32xf32, #tpu.memory_space<vmem>>, vector<1x32xf32>
    %36 = vector.broadcast %35 : vector<1x32xf32> to vector<16x32xf32>
    %37 = arith.addf %34, %36 : vector<16x32xf32>
    %c0_26 = arith.constant 0 : index
    %c0_27 = arith.constant 0 : index
    %38 = vector.load %arg11[%c0_26, %c0_27] : memref<32x32xf32, #tpu.memory_space<vmem>>, vector<32x32xf32>
    %cst_28 = arith.constant dense<0.000000e+00> : vector<16x32xf32>
    %39 = tpu.matmul %26, %38, %cst_28 {dimension_numbers = #tpu.dot_dimension_numbers<[1], [0], [0], [1], [0, 0, 1, 1], [], []>} : vector<16x32xf32>, vector<32x32xf32>, vector<16x32xf32> -> vector<16x32xf32>
    %c0_29 = arith.constant 0 : index
    %c0_30 = arith.constant 0 : index
    %40 = vector.load %arg12[%c0_29, %c0_30] : memref<1x32xf32, #tpu.memory_space<vmem>>, vector<1x32xf32>
    %41 = vector.broadcast %40 : vector<1x32xf32> to vector<16x32xf32>
    %42 = arith.addf %39, %41 : vector<16x32xf32>
    %43 = vector.shape_cast %32 : vector<16x32xf32> to vector<2x8x32xf32>
    %44 = vector.shape_cast %37 : vector<16x32xf32> to vector<2x8x32xf32>
    %45 = vector.shape_cast %42 : vector<16x32xf32> to vector<2x8x32xf32>
    %46 = tpu.concatenate %43, %43, %43, %43 in 1 : vector<2x8x32xf32>, vector<2x8x32xf32>, vector<2x8x32xf32>, vector<2x8x32xf32> -> vector<2x32x32xf32>
    %47 = vector.shape_cast %2 : vector<32x32xf32> to vector<1x32x32xf32>
    %48 = vector.broadcast %47 : vector<1x32x32xf32> to vector<2x32x32xf32>
    %49 = arith.mulf %46, %48 : vector<2x32x32xf32>
    "tpu.trace_start"() <{level = 10 : i32, message = "bqd,bkd->bqk"}> : () -> ()
    %cst_31 = arith.constant dense<0.000000e+00> : vector<2x32x8xf32>
    %50 = tpu.matmul %49, %44, %cst_31 {dimension_numbers = #tpu.dot_dimension_numbers<[2], [2], [1], [1], [0, 0, 0, 1, 1, 1], [0], [0]>} : vector<2x32x32xf32>, vector<2x8x32xf32>, vector<2x32x8xf32> -> vector<2x32x8xf32>
    "tpu.trace_stop"() : () -> ()
    %51 = arith.addf %50, %27 : vector<2x32x8xf32>
    %cst_32 = arith.constant dense<0xFF800000> : vector<2x32xf32>
    %52 = vector.multi_reduction <maximumf>, %51, %cst_32 [2] : vector<2x32x8xf32> to vector<2x32xf32>
    %53 = vector.shape_cast %52 : vector<2x32xf32> to vector<2x32x1xf32>
    %54 = vector.broadcast %53 : vector<2x32x1xf32> to vector<2x32x8xf32>
    %55 = arith.subf %51, %54 : vector<2x32x8xf32>
    %56 = math.exp %55 : vector<2x32x8xf32>
    %cst_33 = arith.constant dense<0.000000e+00> : vector<2x32xf32>
    %57 = vector.multi_reduction <add>, %56, %cst_33 [2] : vector<2x32x8xf32> to vector<2x32xf32>
    %58 = vector.shape_cast %57 : vector<2x32xf32> to vector<2x32x1xf32>
    %59 = tpu.reciprocal %58 : vector<2x32x1xf32> -> vector<2x32x1xf32>
    %60 = vector.broadcast %59 : vector<2x32x1xf32> to vector<2x32x8xf32>
    %61 = arith.mulf %56, %60 : vector<2x32x8xf32>
    "tpu.trace_start"() <{level = 10 : i32, message = "bqk,bkd->bqd"}> : () -> ()
    %cst_34 = arith.constant dense<0.000000e+00> : vector<2x32x32xf32>
    %62 = tpu.matmul %61, %45, %cst_34 {dimension_numbers = #tpu.dot_dimension_numbers<[2], [1], [1], [2], [0, 0, 0, 1, 1, 2], [0], [0]>} : vector<2x32x8xf32>, vector<2x8x32xf32>, vector<2x32x32xf32> -> vector<2x32x32xf32>
    "tpu.trace_stop"() : () -> ()
    %63 = vector.shape_cast %2 : vector<32x32xf32> to vector<1x32x32xf32>
    %64 = vector.broadcast %63 : vector<1x32x32xf32> to vector<2x32x32xf32>
    %65 = arith.mulf %62, %64 : vector<2x32x32xf32>
    %66 = vector.extract_strided_slice %65 {offsets = [0, 0, 0], sizes = [2, 8, 32], strides = [1, 1, 1]} : vector<2x32x32xf32> to vector<2x8x32xf32>
    %67 = vector.extract_strided_slice %65 {offsets = [0, 8, 0], sizes = [2, 8, 32], strides = [1, 1, 1]} : vector<2x32x32xf32> to vector<2x8x32xf32>
    %68 = arith.addf %66, %67 : vector<2x8x32xf32>
    %69 = vector.extract_strided_slice %65 {offsets = [0, 16, 0], sizes = [2, 8, 32], strides = [1, 1, 1]} : vector<2x32x32xf32> to vector<2x8x32xf32>
    %70 = arith.addf %68, %69 : vector<2x8x32xf32>
    %71 = vector.extract_strided_slice %65 {offsets = [0, 24, 0], sizes = [2, 8, 32], strides = [1, 1, 1]} : vector<2x32x32xf32> to vector<2x8x32xf32>
    %72 = arith.addf %70, %71 : vector<2x8x32xf32>
    %73 = vector.shape_cast %72 : vector<2x8x32xf32> to vector<16x32xf32>
    %c0_35 = arith.constant 0 : index
    %c0_36 = arith.constant 0 : index
    %74 = vector.load %arg13[%c0_35, %c0_36] : memref<32x32xf32, #tpu.memory_space<vmem>>, vector<32x32xf32>
    %cst_37 = arith.constant dense<0.000000e+00> : vector<16x32xf32>
    %75 = tpu.matmul %73, %74, %cst_37 {dimension_numbers = #tpu.dot_dimension_numbers<[1], [0], [0], [1], [0, 0, 1, 1], [], []>} : vector<16x32xf32>, vector<32x32xf32>, vector<16x32xf32> -> vector<16x32xf32>
    %c0_38 = arith.constant 0 : index
    %c0_39 = arith.constant 0 : index
    %76 = vector.load %arg14[%c0_38, %c0_39] : memref<1x32xf32, #tpu.memory_space<vmem>>, vector<1x32xf32>
    %77 = vector.broadcast %76 : vector<1x32xf32> to vector<16x32xf32>
    %78 = arith.addf %75, %77 : vector<16x32xf32>
    %79 = arith.addf %0, %78 : vector<16x32xf32>
    %cst_40 = arith.constant dense<0.000000e+00> : vector<16xf32>
    %80 = vector.multi_reduction <add>, %79, %cst_40 [1] : vector<16x32xf32> to vector<16xf32>
    %81 = vector.shape_cast %80 : vector<16xf32> to vector<16x1xf32>
    %cst_41 = arith.constant 3.200000e+01 : f32
    %82 = vector.broadcast %cst_41 : f32 to vector<16x1xf32>
    %83 = arith.divf %81, %82 : vector<16x1xf32>
    %84 = vector.broadcast %83 : vector<16x1xf32> to vector<16x32xf32>
    %85 = arith.subf %79, %84 : vector<16x32xf32>
    %86 = arith.mulf %85, %85 : vector<16x32xf32>
    %cst_42 = arith.constant dense<0.000000e+00> : vector<16xf32>
    %87 = vector.multi_reduction <add>, %86, %cst_42 [1] : vector<16x32xf32> to vector<16xf32>
    %88 = vector.shape_cast %87 : vector<16xf32> to vector<16x1xf32>
    %cst_43 = arith.constant 3.200000e+01 : f32
    %89 = vector.broadcast %cst_43 : f32 to vector<16x1xf32>
    %90 = arith.divf %88, %89 : vector<16x1xf32>
    %91 = vector.broadcast %83 : vector<16x1xf32> to vector<16x32xf32>
    %92 = arith.subf %79, %91 : vector<16x32xf32>
    %cst_44 = arith.constant 9.99999997E-7 : f32
    %93 = vector.broadcast %cst_44 : f32 to vector<16x1xf32>
    %94 = arith.addf %90, %93 : vector<16x1xf32>
    %95 = math.rsqrt %94 : vector<16x1xf32>
    %96 = vector.broadcast %95 : vector<16x1xf32> to vector<16x32xf32>
    %97 = arith.mulf %92, %96 : vector<16x32xf32>
    %c0_45 = arith.constant 0 : index
    %c0_46 = arith.constant 0 : index
    %98 = vector.load %arg15[%c0_45, %c0_46] : memref<1x32xf32, #tpu.memory_space<vmem>>, vector<1x32xf32>
    %99 = vector.broadcast %98 : vector<1x32xf32> to vector<16x32xf32>
    %100 = arith.mulf %97, %99 : vector<16x32xf32>
    %c0_47 = arith.constant 0 : index
    %c0_48 = arith.constant 0 : index
    %101 = vector.load %arg16[%c0_47, %c0_48] : memref<1x32xf32, #tpu.memory_space<vmem>>, vector<1x32xf32>
    %102 = vector.broadcast %101 : vector<1x32xf32> to vector<16x32xf32>
    %103 = arith.addf %100, %102 : vector<16x32xf32>
    %c0_49 = arith.constant 0 : index
    %c0_50 = arith.constant 0 : index
    %c0_51 = arith.constant 0 : index
    %104 = vector.load %arg3[%c0_49, %c0_50, %c0_51] : memref<2x32x8xf32, #tpu.memory_space<vmem>>, vector<2x32x8xf32>
    %c0_52 = arith.constant 0 : index
    %c0_53 = arith.constant 0 : index
    %105 = vector.load %arg17[%c0_52, %c0_53] : memref<32x32xf32, #tpu.memory_space<vmem>>, vector<32x32xf32>
    %cst_54 = arith.constant dense<0.000000e+00> : vector<16x32xf32>
    %106 = tpu.matmul %103, %105, %cst_54 {dimension_numbers = #tpu.dot_dimension_numbers<[1], [0], [0], [1], [0, 0, 1, 1], [], []>} : vector<16x32xf32>, vector<32x32xf32>, vector<16x32xf32> -> vector<16x32xf32>
    %c0_55 = arith.constant 0 : index
    %c0_56 = arith.constant 0 : index
    %107 = vector.load %arg18[%c0_55, %c0_56] : memref<1x32xf32, #tpu.memory_space<vmem>>, vector<1x32xf32>
    %108 = vector.broadcast %107 : vector<1x32xf32> to vector<16x32xf32>
    %109 = arith.addf %106, %108 : vector<16x32xf32>
    %c0_57 = arith.constant 0 : index
    %c0_58 = arith.constant 0 : index
    %110 = vector.load %arg19[%c0_57, %c0_58] : memref<32x32xf32, #tpu.memory_space<vmem>>, vector<32x32xf32>
    %cst_59 = arith.constant dense<0.000000e+00> : vector<16x32xf32>
    %111 = tpu.matmul %1, %110, %cst_59 {dimension_numbers = #tpu.dot_dimension_numbers<[1], [0], [0], [1], [0, 0, 1, 1], [], []>} : vector<16x32xf32>, vector<32x32xf32>, vector<16x32xf32> -> vector<16x32xf32>
    %c0_60 = arith.constant 0 : index
    %c0_61 = arith.constant 0 : index
    %112 = vector.load %arg20[%c0_60, %c0_61] : memref<1x32xf32, #tpu.memory_space<vmem>>, vector<1x32xf32>
    %113 = vector.broadcast %112 : vector<1x32xf32> to vector<16x32xf32>
    %114 = arith.addf %111, %113 : vector<16x32xf32>
    %c0_62 = arith.constant 0 : index
    %c0_63 = arith.constant 0 : index
    %115 = vector.load %arg21[%c0_62, %c0_63] : memref<32x32xf32, #tpu.memory_space<vmem>>, vector<32x32xf32>
    %cst_64 = arith.constant dense<0.000000e+00> : vector<16x32xf32>
    %116 = tpu.matmul %1, %115, %cst_64 {dimension_numbers = #tpu.dot_dimension_numbers<[1], [0], [0], [1], [0, 0, 1, 1], [], []>} : vector<16x32xf32>, vector<32x32xf32>, vector<16x32xf32> -> vector<16x32xf32>
    %c0_65 = arith.constant 0 : index
    %c0_66 = arith.constant 0 : index
    %117 = vector.load %arg22[%c0_65, %c0_66] : memref<1x32xf32, #tpu.memory_space<vmem>>, vector<1x32xf32>
    %118 = vector.broadcast %117 : vector<1x32xf32> to vector<16x32xf32>
    %119 = arith.addf %116, %118 : vector<16x32xf32>
    %120 = vector.shape_cast %109 : vector<16x32xf32> to vector<2x8x32xf32>
    %121 = vector.shape_cast %114 : vector<16x32xf32> to vector<2x8x32xf32>
    %122 = vector.shape_cast %119 : vector<16x32xf32> to vector<2x8x32xf32>
    %123 = tpu.concatenate %120, %120, %120, %120 in 1 : vector<2x8x32xf32>, vector<2x8x32xf32>, vector<2x8x32xf32>, vector<2x8x32xf32> -> vector<2x32x32xf32>
    %124 = vector.shape_cast %2 : vector<32x32xf32> to vector<1x32x32xf32>
    %125 = vector.broadcast %124 : vector<1x32x32xf32> to vector<2x32x32xf32>
    %126 = arith.mulf %123, %125 : vector<2x32x32xf32>
    "tpu.trace_start"() <{level = 10 : i32, message = "bqd,bkd->bqk"}> : () -> ()
    %cst_67 = arith.constant dense<0.000000e+00> : vector<2x32x8xf32>
    %127 = tpu.matmul %126, %121, %cst_67 {dimension_numbers = #tpu.dot_dimension_numbers<[2], [2], [1], [1], [0, 0, 0, 1, 1, 1], [0], [0]>} : vector<2x32x32xf32>, vector<2x8x32xf32>, vector<2x32x8xf32> -> vector<2x32x8xf32>
    "tpu.trace_stop"() : () -> ()
    %128 = arith.addf %127, %104 : vector<2x32x8xf32>
    %cst_68 = arith.constant dense<0xFF800000> : vector<2x32xf32>
    %129 = vector.multi_reduction <maximumf>, %128, %cst_68 [2] : vector<2x32x8xf32> to vector<2x32xf32>
    %130 = vector.shape_cast %129 : vector<2x32xf32> to vector<2x32x1xf32>
    %131 = vector.broadcast %130 : vector<2x32x1xf32> to vector<2x32x8xf32>
    %132 = arith.subf %128, %131 : vector<2x32x8xf32>
    %133 = math.exp %132 : vector<2x32x8xf32>
    %cst_69 = arith.constant dense<0.000000e+00> : vector<2x32xf32>
    %134 = vector.multi_reduction <add>, %133, %cst_69 [2] : vector<2x32x8xf32> to vector<2x32xf32>
    %135 = vector.shape_cast %134 : vector<2x32xf32> to vector<2x32x1xf32>
    %136 = tpu.reciprocal %135 : vector<2x32x1xf32> -> vector<2x32x1xf32>
    %137 = vector.broadcast %136 : vector<2x32x1xf32> to vector<2x32x8xf32>
    %138 = arith.mulf %133, %137 : vector<2x32x8xf32>
    "tpu.trace_start"() <{level = 10 : i32, message = "bqk,bkd->bqd"}> : () -> ()
    %cst_70 = arith.constant dense<0.000000e+00> : vector<2x32x32xf32>
    %139 = tpu.matmul %138, %122, %cst_70 {dimension_numbers = #tpu.dot_dimension_numbers<[2], [1], [1], [2], [0, 0, 0, 1, 1, 2], [0], [0]>} : vector<2x32x8xf32>, vector<2x8x32xf32>, vector<2x32x32xf32> -> vector<2x32x32xf32>
    "tpu.trace_stop"() : () -> ()
    %140 = vector.shape_cast %2 : vector<32x32xf32> to vector<1x32x32xf32>
    %141 = vector.broadcast %140 : vector<1x32x32xf32> to vector<2x32x32xf32>
    %142 = arith.mulf %139, %141 : vector<2x32x32xf32>
    %143 = vector.extract_strided_slice %142 {offsets = [0, 0, 0], sizes = [2, 8, 32], strides = [1, 1, 1]} : vector<2x32x32xf32> to vector<2x8x32xf32>
    %144 = vector.extract_strided_slice %142 {offsets = [0, 8, 0], sizes = [2, 8, 32], strides = [1, 1, 1]} : vector<2x32x32xf32> to vector<2x8x32xf32>
    %145 = arith.addf %143, %144 : vector<2x8x32xf32>
    %146 = vector.extract_strided_slice %142 {offsets = [0, 16, 0], sizes = [2, 8, 32], strides = [1, 1, 1]} : vector<2x32x32xf32> to vector<2x8x32xf32>
    %147 = arith.addf %145, %146 : vector<2x8x32xf32>
    %148 = vector.extract_strided_slice %142 {offsets = [0, 24, 0], sizes = [2, 8, 32], strides = [1, 1, 1]} : vector<2x32x32xf32> to vector<2x8x32xf32>
    %149 = arith.addf %147, %148 : vector<2x8x32xf32>
    %150 = vector.shape_cast %149 : vector<2x8x32xf32> to vector<16x32xf32>
    %c0_71 = arith.constant 0 : index
    %c0_72 = arith.constant 0 : index
    %151 = vector.load %arg23[%c0_71, %c0_72] : memref<32x32xf32, #tpu.memory_space<vmem>>, vector<32x32xf32>
    %cst_73 = arith.constant dense<0.000000e+00> : vector<16x32xf32>
    %152 = tpu.matmul %150, %151, %cst_73 {dimension_numbers = #tpu.dot_dimension_numbers<[1], [0], [0], [1], [0, 0, 1, 1], [], []>} : vector<16x32xf32>, vector<32x32xf32>, vector<16x32xf32> -> vector<16x32xf32>
    %c0_74 = arith.constant 0 : index
    %c0_75 = arith.constant 0 : index
    %153 = vector.load %arg24[%c0_74, %c0_75] : memref<1x32xf32, #tpu.memory_space<vmem>>, vector<1x32xf32>
    %154 = vector.broadcast %153 : vector<1x32xf32> to vector<16x32xf32>
    %155 = arith.addf %152, %154 : vector<16x32xf32>
    %156 = arith.addf %79, %155 : vector<16x32xf32>
    %cst_76 = arith.constant dense<0.000000e+00> : vector<16xf32>
    %157 = vector.multi_reduction <add>, %156, %cst_76 [1] : vector<16x32xf32> to vector<16xf32>
    %158 = vector.shape_cast %157 : vector<16xf32> to vector<16x1xf32>
    %cst_77 = arith.constant 3.200000e+01 : f32
    %159 = vector.broadcast %cst_77 : f32 to vector<16x1xf32>
    %160 = arith.divf %158, %159 : vector<16x1xf32>
    %161 = vector.broadcast %160 : vector<16x1xf32> to vector<16x32xf32>
    %162 = arith.subf %156, %161 : vector<16x32xf32>
    %163 = arith.mulf %162, %162 : vector<16x32xf32>
    %cst_78 = arith.constant dense<0.000000e+00> : vector<16xf32>
    %164 = vector.multi_reduction <add>, %163, %cst_78 [1] : vector<16x32xf32> to vector<16xf32>
    %165 = vector.shape_cast %164 : vector<16xf32> to vector<16x1xf32>
    %cst_79 = arith.constant 3.200000e+01 : f32
    %166 = vector.broadcast %cst_79 : f32 to vector<16x1xf32>
    %167 = arith.divf %165, %166 : vector<16x1xf32>
    %168 = vector.broadcast %160 : vector<16x1xf32> to vector<16x32xf32>
    %169 = arith.subf %156, %168 : vector<16x32xf32>
    %cst_80 = arith.constant 9.99999997E-7 : f32
    %170 = vector.broadcast %cst_80 : f32 to vector<16x1xf32>
    %171 = arith.addf %167, %170 : vector<16x1xf32>
    %172 = math.rsqrt %171 : vector<16x1xf32>
    %173 = vector.broadcast %172 : vector<16x1xf32> to vector<16x32xf32>
    %174 = arith.mulf %169, %173 : vector<16x32xf32>
    %c0_81 = arith.constant 0 : index
    %c0_82 = arith.constant 0 : index
    %175 = vector.load %arg25[%c0_81, %c0_82] : memref<1x32xf32, #tpu.memory_space<vmem>>, vector<1x32xf32>
    %176 = vector.broadcast %175 : vector<1x32xf32> to vector<16x32xf32>
    %177 = arith.mulf %174, %176 : vector<16x32xf32>
    %c0_83 = arith.constant 0 : index
    %c0_84 = arith.constant 0 : index
    %178 = vector.load %arg26[%c0_83, %c0_84] : memref<1x32xf32, #tpu.memory_space<vmem>>, vector<1x32xf32>
    %179 = vector.broadcast %178 : vector<1x32xf32> to vector<16x32xf32>
    %180 = arith.addf %177, %179 : vector<16x32xf32>
    %c0_85 = arith.constant 0 : index
    %c0_86 = arith.constant 0 : index
    %181 = vector.load %arg27[%c0_85, %c0_86] : memref<32x128xf32, #tpu.memory_space<vmem>>, vector<32x128xf32>
    %cst_87 = arith.constant dense<0.000000e+00> : vector<16x128xf32>
    %182 = tpu.matmul %180, %181, %cst_87 {dimension_numbers = #tpu.dot_dimension_numbers<[1], [0], [0], [1], [0, 0, 1, 1], [], []>} : vector<16x32xf32>, vector<32x128xf32>, vector<16x128xf32> -> vector<16x128xf32>
    %c0_88 = arith.constant 0 : index
    %c0_89 = arith.constant 0 : index
    %183 = vector.load %arg28[%c0_88, %c0_89] : memref<1x128xf32, #tpu.memory_space<vmem>>, vector<1x128xf32>
    %184 = vector.broadcast %183 : vector<1x128xf32> to vector<16x128xf32>
    %185 = arith.addf %182, %184 : vector<16x128xf32>
    %cst_90 = arith.constant 0.000000e+00 : f32
    %186 = vector.broadcast %cst_90 : f32 to vector<16x128xf32>
    %187 = arith.maximumf %185, %186 : vector<16x128xf32>
    %c0_91 = arith.constant 0 : index
    %c0_92 = arith.constant 0 : index
    %188 = vector.load %arg29[%c0_91, %c0_92] : memref<128x32xf32, #tpu.memory_space<vmem>>, vector<128x32xf32>
    %cst_93 = arith.constant dense<0.000000e+00> : vector<16x32xf32>
    %189 = tpu.matmul %187, %188, %cst_93 {dimension_numbers = #tpu.dot_dimension_numbers<[1], [0], [0], [1], [0, 0, 1, 1], [], []>} : vector<16x128xf32>, vector<128x32xf32>, vector<16x32xf32> -> vector<16x32xf32>
    %190 = arith.addf %156, %189 : vector<16x32xf32>
    %c0_94 = arith.constant 0 : index
    %c0_95 = arith.constant 0 : index
    %191 = vector.load %arg30[%c0_94, %c0_95] : memref<1x32xf32, #tpu.memory_space<vmem>>, vector<1x32xf32>
    %192 = vector.broadcast %191 : vector<1x32xf32> to vector<16x32xf32>
    %193 = arith.addf %190, %192 : vector<16x32xf32>
    %c0_96 = arith.constant 0 : index
    %c0_97 = arith.constant 0 : index
    %194 = vector.load %arg31[%c0_96, %c0_97] : memref<16x32xf32, #tpu.memory_space<vmem>>, vector<16x32xf32>
    tpu.vector_store %arg31[%c0_96, %c0_97], %193 {strides = array<i32>} : memref<16x32xf32, #tpu.memory_space<vmem>>, vector<16x32xf32>,
    return
  }
}

</mosaic_0001>

<bundles_post_ra>
// kernel: decoder_layer.1
= control target key start
LH: loop header
LB: loop body
LE: loop exit
PB: predicated region body
PF: predicated region fallthrough
CT: control target
= control target key end

     0   :  { %s2885_s6 = smov 1   ;;  %s2886_s10 = smov 2   ;;  %s3366_s0 = inlined_call_operand.smem [shape: u32[32], index: -1, kind: input, shape index: {}] }
   0x1   :  { %s2927_s5 = sld [smem:[%s3366_s0]]   ;;  %s2887_s14 = smov 3  }
   0x2   :  { %s2932_s9 = sld [smem:[%s3366_s0 + %s2885_s6]]   ;;  %s2888_s18 = smov 4  }
   0x3   :  { %s2937_s13 = sld [smem:[%s3366_s0 + %s2886_s10]]   ;;  %s2889_s22 = smov 5  }
   0x4   :  { %s2942_s17 = sld [smem:[%s3366_s0 + %s2887_s14]]   ;;  %s2890_s26 = smov 6  }
   0x5   :  { %s2947_s21 = sld [smem:[%s3366_s0 + %s2888_s18]]   ;;  %s2891_s30 = smov 7  }
   0x6   :  { %s2952_s25 = sld [smem:[%s3366_s0 + %s2889_s22]]   ;;  %s2892_s4 = smov 8  }
   0x7   :  { %s2957_s29 = sld [smem:[%s3366_s0 + %s2890_s26]]   ;;  %s2893_s10 = smov 9  }
   0x8   :  { %3373 = sst [smem:[#allocation5_spill]] %s2932_s9  ;;  %s2894_s15 = smov 10  }
   0x9   :  { %s2962_s3 = sld [smem:[%s3366_s0 + %s2891_s30]]   ;;  %s2895_s20 = smov 11  }
   0xa   :  { %3374 = sst [smem:[#allocation6_spill]] %s2942_s17  ;;  %s2896_s26 = smov 12  }
   0xb   :  { %s2967_s8 = sld [smem:[%s3366_s0 + %s2892_s4]]   ;;  %s2897_s1 = smov 13  }
   0xc   :  { %s2972_s14 = sld [smem:[%s3366_s0 + %s2893_s10]]   ;;  %s2898_s7 = smov 14  }
   0xd   :  { %s2977_s19 = sld [smem:[%s3366_s0 + %s2894_s15]]   ;;  %s2899_s15 = smov 15  }
   0xe   :  { %s2982_s24 = sld [smem:[%s3366_s0 + %s2895_s20]]   ;;  %s2900_s22 = smov 16  }
   0xf   :  { %s2987_s30 = sld [smem:[%s3366_s0 + %s2896_s26]]   ;;  %s2901_s28 = smov 17  }
  0x10   :  { %s2992_s6 = sld [smem:[%s3366_s0 + %s2897_s1]]  }
  0x11   :  { %s2997_s12 = sld [smem:[%s3366_s0 + %s2898_s7]]   ;;  %s2902_s7 = smov 18  }
  0x12   :  { %s3002_s20 = sld [smem:[%s3366_s0 + %s2899_s15]]   ;;  %s2903_s15 = smov 19  }
  0x13   :  { %s3007_s27 = sld [smem:[%s3366_s0 + %s2900_s22]]   ;;  %s2904_s22 = smov 20  }
  0x14   :  { %s3012_s4 = sld [smem:[%s3366_s0 + %s2901_s28]]   ;;  %s2905_s28 = smov 21  }
  0x15   :  { %s3017_s17 = sld [smem:[%s3366_s0 + %s2902_s7]]   ;;  %s2906_s7 = smov 22  }
  0x16   :  { %s3032_s9 = sld [smem:[%s3366_s0 + %s2905_s28]]   ;;  %s2909_s28 = smov 25  }
  0x18   :  { %3375 = sst [smem:[#allocation7_spill]] %s3002_s20 }
  0x19   :  { %3376 = sst [smem:[#allocation8_spill]] %s3007_s27 }
  0x1a   :  { %3377 = sst [smem:[#allocation9_spill]] %s3012_s4 }
  0x1b   :  { %3378 = sst [smem:[#allocation10_spill]] %s3017_s17 }
  0x1c   :  { %s3022_s20 = sld [smem:[%s3366_s0 + %s2903_s15]]   ;;  %s2907_s15 = smov 23  }
  0x1d   :  { %s3027_s27 = sld [smem:[%s3366_s0 + %s2904_s22]]   ;;  %s2908_s22 = smov 24  }
  0x1e   :  { %3380 = sst [smem:[#allocation12_spill]] %s3032_s9 }
  0x1f   :  { %s3037_s17 = sld [smem:[%s3366_s0 + %s2906_s7]]   ;;  %s2910_s7 = smov 26  }
  0x20   :  { %s3042_s4 = sld [smem:[%s3366_s0 + %s2907_s15]]   ;;  %s2911_s15 = smov 27  }
  0x21   :  { %s3052_s9 = sld [smem:[%s3366_s0 + %s2909_s28]]   ;;  %s2913_s28 = smov 29  }
  0x23   :  { %3379 = sst [smem:[#allocation11_spill]] %s3027_s27 }
  0x24   :  { %s3047_s27 = sld [smem:[%s3366_s0 + %s2908_s22]]   ;;  %s2912_s22 = smov 28  }
  0x25   :  { %3381 = sst [smem:[#allocation13_spill]] %s3037_s17 }
  0x26   :  { %3382 = sst [smem:[#allocation14_spill]] %s3042_s4 }
  0x27   :  { %3384 = sst [smem:[#allocation16_spill]] %s3052_s9 }
  0x28   :  { %s3057_s17 = sld [smem:[%s3366_s0 + %s2910_s7]]   ;;  %s2914_s7 = smov 30  }
  0x29   :  { %s3062_s4 = sld [smem:[%s3366_s0 + %s2911_s15]]   ;;  %s2915_s15 = smov 31  }
  0x2a   :  { %3383 = sst [smem:[#allocation15_spill]] %s3047_s27 }
  0x2b   :  { %s3067_s27 = sld [smem:[%s3366_s0 + %s2912_s22]]  }
  0x2c   :  { %s3072_s9 = sld [smem:[%s3366_s0 + %s2913_s28]]  }
  0x2e   :  { %3385 = sst [smem:[#allocation17_spill]] %s3057_s17 }
  0x2f   :  { %3386 = sst [smem:[#allocation18_spill]] %s3062_s4 }
  0x30   :  { %s3077_s17 = sld [smem:[%s3366_s0 + %s2914_s7]]  }
  0x31   :  { %s3082_s4 = sld [smem:[%s3366_s0 + %s2915_s15]]  }
  0x32   :  { %v3085_v0 = vld [vmem:[%s2927_s5] sm:$0xff]  ;;  %vm139_vm0 = vcmask 261120   ;;  %v3088_v1 = vld [vmem:[%s2927_s5 + $0x8] sm:$0xff] }
  0x33   :  { %68 = vsyncpa [#allocation3], 0  ;;  %v140_v2 = vsel %vm139_vm0, %v3085_v0, 0.0  ;;  %v143_v3 = vsel %vm139_vm0, %v3088_v1, 0.0  ;;  %v193_v14 = vld [vmem:[%s2962_s3] sm:$0xff]  ;;  %v194_v15 = vld [vmem:[%s2962_s3 + $0x8] sm:$0xff] }
  0x34   :  { %141 = vadd.xlane.f32.xlu0 %v140_v2  ;;  %v195_v16 = vld [vmem:[%s2962_s3 + $0x10] sm:$0xff]  ;;  %v2645_v17 = vpack.c.bf16 %v194_v15, %v193_v14  ;;  %v196_v18 = vld [vmem:[%s2962_s3 + $0x18] sm:$0xff]  ;;  %v285_v20 = vld [vmem:[%s2972_s14] sm:$0xff]  ;;  %vm665_vm1 = vcmask 64512   ;;  %s3387_s0 = sld [smem:[#allocation9_spill]]  ;;  %s3388_s5 = sld [smem:[#allocation5_spill]] }
  0x35   :  { %v2649_v19 = vpack.c.bf16 %v196_v18, %v195_v16  ;;  %v286_v21 = vld [vmem:[%s2972_s14 + $0x8] sm:$0xff]  ;;  %v2265_v30 = vld [vmem:[%s2952_s25] ss:$0 sm:$0xff]  ;;  %v287_v37 = vld [vmem:[%s2972_s14 + $0x10] sm:$0xff]  ;;  %s3391_s25 = sld [smem:[#allocation8_spill]]  ;;  %s3393_s3 = sld [smem:[#allocation10_spill]] }
  0x36   :  { %2646 = vmatprep.subr.bf16.mxu0 %v2645_v17  ;;  %v2653_v22 = vpack.c.bf16 %v286_v21, %v285_v20  ;;  %v2266_v32 = vld [vmem:[%s2957_s29] ss:$0 sm:$0xff]  ;;  %v288_v38 = vld [vmem:[%s2972_s14 + $0x18] sm:$0xff]  ;;  %v372_v43 = vld [vmem:[%s2982_s24 + $0x8] sm:$0xff]  ;;  %s3392_s29 = sld [smem:[#allocation11_spill]]  ;;  %s3395_s14 = sld [smem:[#allocation6_spill]] }
  0x37   :  { %2648 = vmatpush3.bf16.msra.mxu0 %v2645_v17  ;;  %v2657_v41 = vpack.c.bf16 %v288_v38, %v287_v37  ;;  %v371_v42 = vld [vmem:[%s2982_s24] sm:$0xff]  ;;  %v373_v45 = vld [vmem:[%s2982_s24 + $0x10] sm:$0xff]  ;;  %v374_v46 = vld [vmem:[%s2982_s24 + $0x18] sm:$0xff]  ;;  %s3397_s24 = sld [smem:[#allocation15_spill]] }
  0x38   :  { %144 = vadd.xlane.f32.xlu0 %v143_v3  ;;  %2650 = vmatprep.subr.bf16.mxu0 %v2649_v19  ;;  %v2661_v44 = vpack.c.bf16 %v372_v43, %v371_v42  ;;  %v2665_v47 = vpack.c.bf16 %v374_v46, %v373_v45  ;;  %v2267_v48 = vld [vmem:[%s2967_s8] ss:$0 sm:$0xff]  ;;  %v3123_v52 = vld [vmem:[%s2947_s21 + $0x10] sm:$0xff]  ;;  %v3131_v60 = vld [vmem:[%s2947_s21 + $0x8] sm:$0xff]  ;;  %s3394_s8 = sld [smem:[#allocation13_spill]] }
  0x39   :  { %v3120_v51 = vld [vmem:[%s2947_s21] sm:$0xff]  ;;  %v3134_v62 = vld [vmem:[%s2947_s21 + $0x18] sm:$0xff]  ;;  %v187_v21 = vld [vmem:[%s2937_s13 + $0x10] sm:$0xff]  ;;  %s3390_s21 = sld [smem:[#allocation7_spill]] }
  0x3a   :  { %v2270_v56 = vld [vmem:[%s2977_s19] ss:$0 sm:$0xff]  ;;  %v188_v16 = vld [vmem:[%s2937_s13 + $0x18] sm:$0xff]  ;;  %v191_v38 = vld [vmem:[%s2937_s13 + $0x30] sm:$0xff]  ;;  %s3396_s19 = sld [smem:[#allocation14_spill]] }
  0x3b   :  { %2652 = vmatpush3.bf16.msra.mxu0 %v2649_v19  ;;  %v2273_v3 = vld [vmem:[%s2987_s30] ss:$0 sm:$0xff]  ;;  %s3398_s30 = sld [smem:[#allocation18_spill]] }
  0x3c   :  { %2654 = vmatprep.subr.bf16.mxu0 %v2653_v22  ;;  %v185_v14 = vld [vmem:[%s2937_s13] sm:$0xff] }
  0xc1   :  { %v142_v4 = vpop.xlane.xlu0 %141 }
  0xc2   :  { %v147_v5 = vmul.f32 0.03125, %v142_v4 }
  0xc4   :  { %v149_v6 = vsub.f32 %v3085_v0, %v147_v5 }
  0xc5   :  { %v145_v7 = vpop.xlane.xlu0 %144 }
  0xc6   :  { %v148_v8 = vmul.f32 0.03125, %v145_v7  ;;  %v151_v9 = vmul.f32 %v149_v6, %v149_v6 }
  0xc8   :  { %v150_v10 = vsub.f32 %v3088_v1, %v148_v8  ;;  %v153_v11 = vsel %vm139_vm0, %v151_v9, 0.0 }
  0xc9   :  { %154 = vadd.xlane.f32.xlu1 %v153_v11 }
  0xca   :  { %v152_v12 = vmul.f32 %v150_v10, %v150_v10 }
  0xcc   :  { %v156_v13 = vsel %vm139_vm0, %v152_v12, 0.0 }
  0xcd   :  { %157 = vadd.xlane.f32.xlu1 %v156_v13  ;;  %v186_v13 = vld [vmem:[%s2937_s13 + $0x8] sm:$0xff] }
 0x156   :  { %v155_v23 = vpop.xlane.xlu1 %154 }
 0x157   :  { %v159_v24 = vmul.f32 0.03125, %v155_v23 }
 0x159   :  { %v161_v25 = vadd.f32 1e-06, %v159_v24 }
 0x15a   :  { %v158_v26 = vpop.xlane.xlu1 %157 }
 0x15b   :  { %2785 = vrsqrt.f32 %v161_v25  ;;  %v160_v27 = vmul.f32 0.03125, %v158_v26  ;;  %v190_v26 = vld [vmem:[%s2937_s13 + $0x28] sm:$0xff] }
 0x15d   :  { %v162_v28 = vadd.f32 1e-06, %v160_v27 }
 0x15f   :  { %2787 = vrsqrt.f32 %v162_v28 }
 0x165   :  { %v2786_v29 = vpop.eup %2785 }
 0x166   :  { %v165_v31 = vmul.f32 %v2786_v29, %v149_v6 }
 0x168   :  { %v174_v33 = vmul.f32 %v2265_v30, %v165_v31 }
 0x169   :  { %v2788_v34 = vpop.eup %2787 }
 0x16a   :  { %v166_v35 = vmul.f32 %v2788_v34, %v150_v10  ;;  %v183_v36 = vadd.f32 %v2266_v32, %v174_v33  ;;  %v192_v34 = vld [vmem:[%s2937_s13 + $0x38] sm:$0xff] }
 0x16c   :  { %v175_v39 = vmul.f32 %v2265_v30, %v166_v35  ;;  %2455 = vmatprep.mubr.msk.f32.mxu0 %vm139_vm0, %v183_v36  ;;  %v189_v30 = vld [vmem:[%s2937_s13 + $0x20] sm:$0xff]  ;;  %s3389_s13 = sld [smem:[#allocation12_spill]] }
 0x16e   :  { %v184_v40 = vadd.f32 %v2266_v32, %v175_v39 }
 0x170   :  { %2456 = vmatmul.mubr.msk.f32.vlgmr.msra.gmra.mrb[0].mxu0 %vm139_vm0, %v184_v40 }
 0x171   :  { %2656 = vmatpush3.bf16.msra.mxu0 %v2653_v22  ;;  %2466 = vmatprep.mubr.msk.f32.mxu0 %vm139_vm0, %v183_v36 }
 0x172   :  { %2658 = vmatprep.subr.bf16.mxu0 %v2657_v41 }
 0x175   :  { %2660 = vmatpush3.bf16.msra.mxu0 %v2657_v41 }
 0x176   :  { %2662 = vmatprep.subr.bf16.mxu0 %v2661_v44 }
 0x178   :  { %2467 = vmatmul.mubr.msk.f32.vlgmr.msra.gmra.mrb[2].mxu0 %vm139_vm0, %v184_v40 }
 0x179   :  { %2664 = vmatpush3.bf16.msra.mxu0 %v2661_v44  ;;  %2477 = vmatprep.mubr.msk.f32.mxu0 %vm139_vm0, %v183_v36 }
 0x17a   :  { %2666 = vmatprep.subr.bf16.mxu0 %v2665_v47 }
 0x17d   :  { %2668 = vmatpush3.bf16.msra.mxu0 %v2665_v47 }
 0x180   :  { %2478 = vmatmul.mubr.msk.f32.vlgmr.msra.gmra.mrb[4].mxu0 %vm139_vm0, %v184_v40 }
 0x243   :  { %v2457_v49 = vpop.f32.mrb[0].mxu0 }
 0x244   :  { %v276_v50 = vpop.f32.mrb[1].mxu0  ;;  %v282_v61 = vadd.f32 %v2457_v49, %v2267_v48 }
 0x245   :  { %v277_v53 = vadd.f32 %v2267_v48, %v276_v50 }
 0x246   :  { %v461_v5 = vmul.f32 %v282_v61, %v3120_v51  ;;  %v462_v9 = vmul.f32 %v282_v61, %v3131_v60  ;;  %v463_v11 = vmul.f32 %v282_v61, %v3123_v52  ;;  %v464_v12 = vmul.f32 %v282_v61, %v3134_v62 }
 0x247   :  { %v457_v54 = vmul.f32 %v277_v53, %v3120_v51  ;;  %v459_v55 = vmul.f32 %v277_v53, %v3123_v52  ;;  %v458_v2 = vmul.f32 %v277_v53, %v3131_v60  ;;  %v460_v4 = vmul.f32 %v277_v53, %v3134_v62 }
 0x249   :  { %2482 = vmatprep.mubr.msk.f32.mxu0 %vm139_vm0, %v457_v54  ;;  %2485 = vmatprep.mubr.msk.f32.mxu1 %vm139_vm0, %v459_v55 }
 0x24b   :  { %v2468_v57 = vpop.f32.mrb[2].mxu0 }
 0x24c   :  { %v362_v58 = vpop.f32.mrb[3].mxu0  ;;  %v368_v63 = vadd.f32 %v2468_v57, %v2270_v56 }
 0x24d   :  { %v363_v59 = vadd.f32 %v2270_v56, %v362_v58 }
 0x24f   :  { %2480 = vmatprep.subr.msk.mxu0 %vm139_vm0, %v363_v59  ;;  %2749 = vmatprep.subr.msk.mxu1 %vm139_vm0, %v363_v59 }
 0x250   :  { %2481 = vmatpush3.xpose.msk.msra.mxu0 %vm139_vm0, %v363_v59  ;;  %2750 = vmatpush3.xpose.msk.msra.mxu1 %vm139_vm0, %v363_v59 }
 0x251   :  { %2488 = vmatprep.subr.msk.mxu0 %vm139_vm0, %v368_v63 }
 0x253   :  { %v2479_v6 = vpop.f32.mrb[4].mxu0  ;;  %2483 = vmatmul.mubr.msk.f32.vlgmr.msra.gmra.mrb[6].mxu0 %vm139_vm0, %v458_v2  ;;  %2486 = vmatmul.mubr.msk.f32.vlgmr.msra.gmra.mrb[0].mxu1 %vm139_vm0, %v460_v4 }
 0x254   :  { %v454_v7 = vadd.f32 %v2479_v6, %v2273_v3  ;;  %v448_v8 = vpop.f32.mrb[5].mxu0  ;;  %2489 = vmatpush3.xpose.msk.msra.mxu0 %vm139_vm0, %v368_v63  ;;  %2490 = vmatprep.mubr.msk.f32.mxu0 %vm139_vm0, %v461_v5 }
 0x255   :  { %v449_v10 = vadd.f32 %v2273_v3, %v448_v8 }
 0x256   :  { %2504 = vmatprep.subr.mxu0 %v454_v7 }
 0x257   :  { %2491 = vmatmul.mubr.msk.f32.vlgmr.msra.gmra.mrb[8].mxu0 %vm139_vm0, %v462_v9  ;;  %2496 = vmatprep.subr.mxu1 %v449_v10 }
 0x258   :  { %2493 = vmatprep.mubr.msk.f32.mxu0 %vm139_vm0, %v463_v11  ;;  %2497 = vmatpush3.msra.mxu1 %v449_v10 }
 0x259   :  { %2505 = vmatpush3.msra.mxu0 %v454_v7 }
 0x25b   :  { %2494 = vmatmul.mubr.msk.f32.gmra.mrb[10].mxu0 %vm139_vm0, %v464_v12 }
 0x326   :  { %v2484_v15 = vpop.f32.mrb[6].mxu0  ;;  %v2487_v17 = vpop.f32.mrb[0].mxu1 }
 0x327   :  { %v552_v18 = vadd.f32 %v2484_v15, %v186_v13  ;;  %v546_v19 = vpop.f32.mrb[7].mxu0  ;;  %v556_v20 = vpop.f32.mrb[1].mxu1  ;;  %v562_v23 = vadd.f32 %v2487_v17, %v188_v16 }
 0x328   :  { %v547_v22 = vadd.f32 %v546_v19, %v185_v14  ;;  %v557_v25 = vadd.f32 %v556_v20, %v187_v21 }
 0x329   :  { %v669_v24 = vsel %vm665_vm1, %v552_v18, -inf  ;;  %v675_v32 = vsel %vm665_vm1, %v562_v23, -inf }
 0x32a   :  { %670 = vmax.xlane.f32.xlu1 %v669_v24  ;;  %v2492_v27 = vpop.f32.mrb[8].mxu0  ;;  %v666_v28 = vsel %vm665_vm1, %v547_v22, -inf  ;;  %v672_v36 = vsel %vm665_vm1, %v557_v25, -inf }
 0x32b   :  { %v646_v29 = vpop.f32.mrb[9].mxu0  ;;  %667 = vmax.xlane.f32.xlu0 %v666_v28  ;;  %v652_v31 = vadd.f32 %v2492_v27, %v190_v26 }
 0x32c   :  { %v647_v33 = vadd.f32 %v646_v29, %v189_v30 }
 0x32d   :  { %v681_v40 = vsel %vm665_vm1, %v652_v31, -inf }
 0x32e   :  { %676 = vmax.xlane.f32.xlu1 %v675_v32  ;;  %v2495_v35 = vpop.f32.mrb[10].mxu0  ;;  %v678_v42 = vsel %vm665_vm1, %v647_v33, -inf }
 0x32f   :  { %v656_v37 = vpop.f32.mrb[11].mxu0  ;;  %673 = vmax.xlane.f32.xlu0 %v672_v36  ;;  %v662_v39 = vadd.f32 %v2495_v35, %v192_v34 }
 0x330   :  { %v657_v41 = vadd.f32 %v656_v37, %v191_v38 }
 0x331   :  { %v687_v43 = vsel %vm665_vm1, %v662_v39, -inf }
 0x332   :  { %682 = vmax.xlane.f32.xlu1 %v681_v40  ;;  %v684_v44 = vsel %vm665_vm1, %v657_v41, -inf }
 0x333   :  { %679 = vmax.xlane.f32.xlu0 %v678_v42 }
 0x336   :  { %688 = vmax.xlane.f32.xlu1 %v687_v43 }
 0x337   :  { %685 = vmax.xlane.f32.xlu0 %v684_v44 }
 0x3b7   :  { %v671_v45 = vpop.xlane.xlu1 %670 }
 0x3b8   :  { %v691_v46 = vsub.f32 %v552_v18, %v671_v45  ;;  %v668_v47 = vpop.xlane.xlu0 %667 }
 0x3b9   :  { %v690_v48 = vsub.f32 %v547_v22, %v668_v47 }
 0x3ba   :  { %v700_v49 = vmul.f32 1.442695, %v691_v46 }
 0x3bb   :  { %v698_v50 = vmul.f32 1.442695, %v690_v48  ;;  %v677_v53 = vpop.xlane.xlu1 %676 }
 0x3bc   :  { %2789 = vpow2.f32 %v700_v49  ;;  %v693_v54 = vsub.f32 %v562_v23, %v677_v53  ;;  %v674_v55 = vpop.xlane.xlu0 %673  ;;  %v962_v53 = vld [vmem:[%s2992_s6] sm:$0xff] }
 0x3bd   :  { %2791 = vpow2.f32 %v698_v50  ;;  %v692_v56 = vsub.f32 %v557_v25, %v674_v55 }
 0x3be   :  { %v704_v57 = vmul.f32 1.442695, %v693_v54  ;;  %v963_v54 = vld [vmem:[%s2992_s6 + $0x8] sm:$0xff] }
 0x3bf   :  { %v702_v58 = vmul.f32 1.442695, %v692_v56  ;;  %v683_v59 = vpop.xlane.xlu1 %682  ;;  %v2669_v55 = vpack.c.bf16 %v963_v54, %v962_v53  ;;  %v964_v56 = vld [vmem:[%s2992_s6 + $0x10] sm:$0xff]  ;;  %v134_v53 = vld [vmem:[%s3388_s5 + $0x8] sm:$0xff]  ;;  %v1292_v54 = vld [vmem:[%s3389_s13] sm:$0xff] }
 0x3c0   :  { %2793 = vpow2.f32 %v704_v57  ;;  %v695_v61 = vsub.f32 %v652_v31, %v683_v59  ;;  %v680_v63 = vpop.xlane.xlu0 %679  ;;  %v965_v57 = vld [vmem:[%s2992_s6 + $0x18] sm:$0xff]  ;;  %s3399_s6 = sld [smem:[#allocation16_spill]] }
 0x3c1   :  { %2795 = vpow2.f32 %v702_v58  ;;  %v694_v2 = vsub.f32 %v647_v33, %v680_v63  ;;  %2670 = vmatprep.subr.bf16.mxu1 %v2669_v55  ;;  %v2673_v58 = vpack.c.bf16 %v965_v57, %v964_v56 }
 0x3c2   :  { %v708_v3 = vmul.f32 1.442695, %v695_v61 }
 0x3c3   :  { %v706_v4 = vmul.f32 1.442695, %v694_v2  ;;  %v689_v5 = vpop.xlane.xlu1 %688 }
 0x3c4   :  { %2797 = vpow2.f32 %v708_v3  ;;  %v697_v6 = vsub.f32 %v662_v39, %v689_v5  ;;  %v686_v7 = vpop.xlane.xlu0 %685 }
 0x3c5   :  { %2799 = vpow2.f32 %v706_v4  ;;  %v696_v8 = vsub.f32 %v657_v41, %v686_v7 }
 0x3c6   :  { %v2790_v9 = vpop.eup %2789  ;;  %v712_v10 = vmul.f32 1.442695, %v697_v6 }
 0x3c7   :  { %v2792_v11 = vpop.eup %2791  ;;  %v710_v12 = vmul.f32 1.442695, %v696_v8  ;;  %v717_v13 = vsel %vm665_vm1, %v2790_v9, 0.0 }
 0x3c8   :  { %2801 = vpow2.f32 %v712_v10  ;;  %718 = vadd.xlane.f32.xlu1 %v717_v13  ;;  %v714_v14 = vsel %vm665_vm1, %v2792_v11, 0.0 }
 0x3c9   :  { %2803 = vpow2.f32 %v710_v12  ;;  %715 = vadd.xlane.f32.xlu0 %v714_v14 }
 0x3ca   :  { %v2794_v15 = vpop.eup %2793 }
 0x3cb   :  { %v2796_v16 = vpop.eup %2795  ;;  %v723_v17 = vsel %vm665_vm1, %v2794_v15, 0.0 }
 0x3cc   :  { %724 = vadd.xlane.f32.xlu1 %v723_v17  ;;  %v720_v18 = vsel %vm665_vm1, %v2796_v16, 0.0 }
 0x3cd   :  { %721 = vadd.xlane.f32.xlu0 %v720_v18 }
 0x3ce   :  { %v2798_v19 = vpop.eup %2797 }
 0x3cf   :  { %v2800_v20 = vpop.eup %2799  ;;  %v729_v21 = vsel %vm665_vm1, %v2798_v19, 0.0 }
 0x3d0   :  { %730 = vadd.xlane.f32.xlu1 %v729_v21  ;;  %v726_v22 = vsel %vm665_vm1, %v2800_v20, 0.0  ;;  %v2294_v21 = vld [vmem:[%s2997_s12] ss:$0 sm:$0xff]  ;;  %s3400_s12 = sld [smem:[#allocation17_spill]] }
 0x3d1   :  { %727 = vadd.xlane.f32.xlu0 %v726_v22 }
 0x3d2   :  { %v2802_v23 = vpop.eup %2801 }
 0x3d3   :  { %v2804_v24 = vpop.eup %2803  ;;  %v735_v25 = vsel %vm665_vm1, %v2802_v23, 0.0 }
 0x3d4   :  { %736 = vadd.xlane.f32.xlu1 %v735_v25  ;;  %v732_v26 = vsel %vm665_vm1, %v2804_v24, 0.0 }
 0x3d5   :  { %733 = vadd.xlane.f32.xlu0 %v732_v26 }
 0x455   :  { %v719_v27 = vpop.xlane.xlu1 %718 }
 0x456   :  { %2805 = vrcp.f32 %v719_v27  ;;  %v716_v28 = vpop.xlane.xlu0 %715 }
 0x457   :  { %2807 = vrcp.f32 %v716_v28 }
 0x459   :  { %v725_v29 = vpop.xlane.xlu1 %724 }
 0x45a   :  { %2809 = vrcp.f32 %v725_v29  ;;  %v722_v30 = vpop.xlane.xlu0 %721 }
 0x45b   :  { %2811 = vrcp.f32 %v722_v30 }
 0x45d   :  { %v731_v31 = vpop.xlane.xlu1 %730 }
 0x45e   :  { %2813 = vrcp.f32 %v731_v31  ;;  %v728_v32 = vpop.xlane.xlu0 %727 }
 0x45f   :  { %2815 = vrcp.f32 %v728_v32 }
 0x460   :  { %v2806_v33 = vpop.eup %2805 }
 0x461   :  { %v2808_v34 = vpop.eup %2807  ;;  %v737_v35 = vpop.xlane.xlu1 %736  ;;  %v747_v38 = vmul.f32 %v2806_v33, %v2790_v9 }
 0x462   :  { %2817 = vrcp.f32 %v737_v35  ;;  %v734_v36 = vpop.xlane.xlu0 %733  ;;  %v746_v37 = vmul.f32 %v2808_v34, %v2792_v11 }
 0x463   :  { %2819 = vrcp.f32 %v734_v36 }
 0x464   :  { %v2810_v39 = vpop.eup %2809  ;;  %2498 = vmatprep.mubr.msk.f32.mxu1 %vm665_vm1, %v746_v37 }
 0x465   :  { %v2812_v40 = vpop.eup %2811  ;;  %2499 = vmatmul.mubr.msk.f32.vlgmr.msra.gmra.mrb[2].mxu1 %vm665_vm1, %v747_v38  ;;  %v749_v42 = vmul.f32 %v2810_v39, %v2794_v15  ;;  %v1200_v38 = vld [vmem:[%s3022_s20] sm:$0xff]  ;;  %v1201_v39 = vld [vmem:[%s3022_s20 + $0x8] sm:$0xff] }
 0x466   :  { %v748_v41 = vmul.f32 %v2812_v40, %v2796_v16  ;;  %2672 = vmatpush3.bf16.msra.mxu1 %v2669_v55  ;;  %v2685_v40 = vpack.c.bf16 %v1201_v39, %v1200_v38  ;;  %v1293_v55 = vld [vmem:[%s3389_s13 + $0x8] sm:$0xff] }
 0x467   :  { %2674 = vmatprep.subr.bf16.mxu1 %v2673_v58  ;;  %v2693_v56 = vpack.c.bf16 %v1293_v55, %v1292_v54  ;;  %v1105_v39 = vld [vmem:[%s3395_s14 + $0x28] sm:$0xff] }
 0x468   :  { %v2814_v43 = vpop.eup %2813  ;;  %2501 = vmatprep.mubr.msk.f32.mxu1 %vm665_vm1, %v748_v41  ;;  %v1108_v41 = vld [vmem:[%s3387_s0] sm:$0xff] }
 0x469   :  { %v2816_v44 = vpop.eup %2815  ;;  %2502 = vmatmul.mubr.msk.f32.gmra.mrb[4].mxu1 %vm665_vm1, %v749_v42  ;;  %v751_v46 = vmul.f32 %v2814_v43, %v2798_v19  ;;  %v1109_v42 = vld [vmem:[%s3387_s0 + $0x8] sm:$0xff] }
 0x46a   :  { %v750_v45 = vmul.f32 %v2816_v44, %v2800_v20  ;;  %2676 = vmatpush3.bf16.msra.mxu1 %v2673_v58  ;;  %v2677_v43 = vpack.c.bf16 %v1109_v42, %v1108_v41  ;;  %v1202_v44 = vld [vmem:[%s3022_s20 + $0x10] sm:$0xff]  ;;  %v1101_v42 = vld [vmem:[%s3395_s14 + $0x8] sm:$0xff] }
 0x46b   :  { %2686 = vmatprep.subr.bf16.mxu1 %v2685_v40 }
 0x46c   :  { %v2818_v47 = vpop.eup %2817  ;;  %2506 = vmatprep.mubr.msk.f32.mxu0 %vm665_vm1, %v750_v45  ;;  %v1203_v45 = vld [vmem:[%s3022_s20 + $0x18] sm:$0xff]  ;;  %2678 = vmatprep.subr.bf16.mxu0 %v2677_v43  ;;  %s2916_s20 = smov [#allocation2]  }
 0x46d   :  { %v2820_v48 = vpop.eup %2819  ;;  %2507 = vmatmul.mubr.msk.f32.vlgmr.msra.gmra.mrb[12].mxu0 %vm665_vm1, %v751_v46  ;;  %v753_v50 = vmul.f32 %v2818_v47, %v2802_v23  ;;  %v2689_v46 = vpack.c.bf16 %v1203_v45, %v1202_v44  ;;  %v1110_v47 = vld [vmem:[%s3387_s0 + $0x10] sm:$0xff]  ;;  %s2223_s22 = sshll.u32 %s2916_s20, 4  ;;  %s2224_s22 = int_to_ptr.vmem [resolvable:$true] %s2223_s22 }
 0x46e   :  { %v752_v49 = vmul.f32 %v2820_v48, %v2804_v24  ;;  %v1111_v48 = vld [vmem:[%s3387_s0 + $0x18] sm:$0xff]  ;;  %2680 = vmatpush3.bf16.msra.mxu0 %v2677_v43  ;;  %p2866_p1 = scmp.lt.s32.totalorder %s2224_s22, %s2224_s22 }
 0x470   :  { %2509 = vmatprep.mubr.msk.f32.mxu0 %vm665_vm1, %v752_v49  ;;  %v133_v49 = vld [vmem:[%s3388_s5] sm:$0xff] }
 0x471   :  { %2510 = vmatmul.mubr.msk.f32.gmra.mrb[14].mxu0 %vm665_vm1, %v753_v50  ;;  %v2681_v50 = vpack.c.bf16 %v1111_v48, %v1110_v47 }
 0x473   :  { %2682 = vmatprep.subr.bf16.mxu0 %v2681_v50 }
 0x474   :  { %2684 = vmatpush3.bf16.msra.mxu0 %v2681_v50 }
 0x475   :  { %2694 = vmatprep.subr.bf16.mxu0 %v2693_v56 }
 0x538   :  { %v2500_v59 = vpop.f32.mrb[2].mxu1 }
 0x539   :  { %v949_v61 = vmul.f32 %v2500_v59, %v3131_v60  ;;  %v832_v63 = vpop.f32.mrb[3].mxu1 }
 0x53a   :  { %v948_v2 = vmul.f32 %v832_v63, %v3120_v51 }
 0x53c   :  { %v956_v3 = vadd.f32 %v949_v61, %v948_v2  ;;  %v2503_v4 = vpop.f32.mrb[4].mxu1 }
 0x53d   :  { %v842_v5 = vpop.f32.mrb[5].mxu1  ;;  %v951_v7 = vmul.f32 %v2503_v4, %v3134_v62  ;;  %v2297_v4 = vld [vmem:[%s3390_s21] ss:$0 sm:$0xff] }
 0x53e   :  { %v950_v6 = vmul.f32 %v842_v5, %v3123_v52 }
 0x540   :  { %v958_v8 = vadd.f32 %v956_v3, %v950_v6  ;;  %v2508_v9 = vpop.f32.mrb[12].mxu0 }
 0x541   :  { %v953_v10 = vmul.f32 %v2508_v9, %v3131_v60  ;;  %v929_v11 = vpop.f32.mrb[13].mxu0  ;;  %v2298_v9 = vld [vmem:[%s3391_s25] ss:$0 sm:$0xff] }
 0x542   :  { %v960_v12 = vadd.f32 %v958_v8, %v951_v7  ;;  %v952_v13 = vmul.f32 %v929_v11, %v3120_v51  ;;  %v1294_v11 = vld [vmem:[%s3389_s13 + $0x10] sm:$0xff] }
 0x544   :  { %v957_v14 = vadd.f32 %v953_v10, %v952_v13  ;;  %v2511_v15 = vpop.f32.mrb[14].mxu0  ;;  %2520 = vmatprep.mubr.msk.f32.mxu1 %vm139_vm0, %v960_v12  ;;  %v1295_v12 = vld [vmem:[%s3389_s13 + $0x18] sm:$0xff] }
 0x545   :  { %v939_v16 = vpop.f32.mrb[15].mxu0  ;;  %v955_v18 = vmul.f32 %v2511_v15, %v3134_v62  ;;  %v2697_v15 = vpack.c.bf16 %v1295_v12, %v1294_v11 }
 0x546   :  { %v954_v17 = vmul.f32 %v939_v16, %v3123_v52  ;;  %v2302_v16 = vld [vmem:[%s3392_s29] ss:$0 sm:$0xff] }
 0x548   :  { %v959_v19 = vadd.f32 %v957_v14, %v954_v17 }
 0x54a   :  { %v961_v20 = vadd.f32 %v959_v19, %v955_v18 }
 0x54c   :  { %2521 = vmatmul.mubr.msk.f32.vlgmr.msra.gmra.mrb[6].mxu1 %vm139_vm0, %v961_v20 }
 0x54d   :  { %2688 = vmatpush3.bf16.msra.mxu1 %v2685_v40  ;;  %2542 = vmatprep.mubr.msk.f32.mxu1 %vm139_vm0, %v133_v49  ;;  %v1104_v40 = vld [vmem:[%s3395_s14 + $0x20] sm:$0xff] }
 0x54e   :  { %2690 = vmatprep.subr.bf16.mxu1 %v2689_v46 }
 0x551   :  { %2692 = vmatpush3.bf16.msra.mxu1 %v2689_v46  ;;  %v1100_v46 = vld [vmem:[%s3395_s14] sm:$0xff] }
 0x554   :  { %2543 = vmatmul.mubr.msk.f32.vlgmr.msra.gmra.mrb[8].mxu1 %vm139_vm0, %v134_v53 }
 0x61f   :  { %v2522_v22 = vpop.f32.mrb[6].mxu1 }
 0x620   :  { %v1051_v23 = vadd.f32 %v2522_v22, %v2294_v21  ;;  %v1045_v24 = vpop.f32.mrb[7].mxu1 }
 0x621   :  { %v1046_v25 = vadd.f32 %v2294_v21, %v1045_v24  ;;  %v2299_v21 = vld [vmem:[%s3393_s3] ss:$0 sm:$0xff] }
 0x622   :  { %v3203_v26 = vadd.f32 %v1051_v23, %v3088_v1 }
 0x623   :  { %v3206_v27 = vadd.f32 %v1046_v25, %v3085_v0 }
 0x624   :  { %v1059_v28 = vsel %vm139_vm0, %v3203_v26, 0.0 }
 0x625   :  { %1060 = vadd.xlane.f32.xlu1 %v1059_v28  ;;  %v1056_v29 = vsel %vm139_vm0, %v3206_v27, 0.0 }
 0x626   :  { %1057 = vadd.xlane.f32.xlu0 %v1056_v29 }
 0x627   :  { %v2544_v17 = vpop.f32.mrb[8].mxu1 }
 0x628   :  { %v1289_v18 = vadd.f32 %v2544_v17, %v2302_v16  ;;  %v1283_v19 = vpop.f32.mrb[9].mxu1 }
 0x629   :  { %v1284_v20 = vadd.f32 %v2302_v16, %v1283_v19 }
 0x62b   :  { %2556 = vmatprep.subr.msk.mxu1 %vm139_vm0, %v1284_v20 }
 0x62c   :  { %2557 = vmatpush3.xpose.msk.msra.mxu1 %vm139_vm0, %v1284_v20 }
 0x6b2   :  { %v1061_v30 = vpop.xlane.xlu1 %1060 }
 0x6b3   :  { %v1063_v31 = vmul.f32 0.03125, %v1061_v30  ;;  %v1058_v32 = vpop.xlane.xlu0 %1057 }
 0x6b4   :  { %v1062_v1 = vmul.f32 0.03125, %v1058_v32 }
 0x6b5   :  { %v1065_v33 = vsub.f32 %v3203_v26, %v1063_v31 }
 0x6b6   :  { %v1064_v0 = vsub.f32 %v3206_v27, %v1062_v1 }
 0x6b7   :  { %v1067_v34 = vmul.f32 %v1065_v33, %v1065_v33 }
 0x6b8   :  { %v1066_v35 = vmul.f32 %v1064_v0, %v1064_v0 }
 0x6b9   :  { %v1071_v36 = vsel %vm139_vm0, %v1067_v34, 0.0 }
 0x6ba   :  { %1072 = vadd.xlane.f32.xlu1 %v1071_v36  ;;  %v1068_v37 = vsel %vm139_vm0, %v1066_v35, 0.0 }
 0x6bb   :  { %1069 = vadd.xlane.f32.xlu0 %v1068_v37 }
 0x747   :  { %v1073_v57 = vpop.xlane.xlu1 %1072 }
 0x748   :  { %v1075_v58 = vmul.f32 0.03125, %v1073_v57  ;;  %v1070_v59 = vpop.xlane.xlu0 %1069 }
 0x749   :  { %v1074_v61 = vmul.f32 0.03125, %v1070_v59  ;;  %v1102_v59 = vld [vmem:[%s3395_s14 + $0x10] sm:$0xff] }
 0x74a   :  { %v1077_v63 = vadd.f32 1e-06, %v1075_v58 }
 0x74b   :  { %v1076_v2 = vadd.f32 1e-06, %v1074_v61 }
 0x74c   :  { %2821 = vrsqrt.f32 %v1077_v63 }
 0x74d   :  { %2823 = vrsqrt.f32 %v1076_v2 }
 0x756   :  { %v2822_v3 = vpop.eup %2821 }
 0x757   :  { %v2824_v5 = vpop.eup %2823  ;;  %v1081_v6 = vmul.f32 %v2822_v3, %v1065_v33  ;;  %v2305_v33 = vld [vmem:[%s3394_s8] ss:$0 sm:$0xff]  ;;  %v1107_v3 = vld [vmem:[%s3395_s14 + $0x38] sm:$0xff] }
 0x758   :  { %v1080_v7 = vmul.f32 %v2824_v5, %v1064_v0 }
 0x759   :  { %v1090_v8 = vmul.f32 %v2297_v4, %v1081_v6  ;;  %v1106_v6 = vld [vmem:[%s3395_s14 + $0x30] sm:$0xff] }
 0x75a   :  { %v1089_v10 = vmul.f32 %v2297_v4, %v1080_v7 }
 0x75b   :  { %v1099_v14 = vadd.f32 %v2298_v9, %v1090_v8 }
 0x75c   :  { %v1098_v13 = vadd.f32 %v2298_v9, %v1089_v10 }
 0x75e   :  { %2531 = vmatprep.mubr.msk.f32.mxu0 %vm139_vm0, %v1098_v13 }
 0x75f   :  { %2532 = vmatmul.mubr.msk.f32.vlgmr.msra.gmra.mrb[16].mxu0 %vm139_vm0, %v1099_v14 }
 0x760   :  { %2696 = vmatpush3.bf16.msra.mxu0 %v2693_v56  ;;  %2553 = vmatprep.mubr.msk.f32.mxu0 %vm139_vm0, %v133_v49  ;;  %v1103_v56 = vld [vmem:[%s3395_s14 + $0x18] sm:$0xff] }
 0x761   :  { %2698 = vmatprep.subr.bf16.mxu0 %v2697_v15 }
 0x764   :  { %2700 = vmatpush3.bf16.msra.mxu0 %v2697_v15 }
 0x765   :  { %2564 = vmatprep.subr.msk.mxu0 %vm139_vm0, %v1289_v18 }
 0x767   :  { %2554 = vmatmul.mubr.msk.f32.vlgmr.msra.gmra.mrb[18].mxu0 %vm139_vm0, %v134_v53 }
 0x76d   :  { %2565 = vmatpush3.xpose.msk.msra.mxu0 %vm139_vm0, %v1289_v18 }
 0x832   :  { %v2533_v22 = vpop.f32.mrb[16].mxu0 }
 0x833   :  { %v1197_v23 = vadd.f32 %v2533_v22, %v2299_v21  ;;  %v1191_v24 = vpop.f32.mrb[17].mxu0 }
 0x834   :  { %v1192_v25 = vadd.f32 %v2299_v21, %v1191_v24 }
 0x835   :  { %v1383_v28 = vmul.f32 %v1197_v23, %v3131_v60  ;;  %v1382_v29 = vmul.f32 %v1197_v23, %v3120_v51  ;;  %v1384_v32 = vmul.f32 %v1197_v23, %v3123_v52  ;;  %v1385_v0 = vmul.f32 %v1197_v23, %v3134_v62 }
 0x836   :  { %v1379_v30 = vmul.f32 %v1192_v25, %v3131_v60  ;;  %v1378_v31 = vmul.f32 %v1192_v25, %v3120_v51  ;;  %v1380_v1 = vmul.f32 %v1192_v25, %v3123_v52  ;;  %v1381_v35 = vmul.f32 %v1192_v25, %v3134_v62 }
 0x837   :  { %2566 = vmatprep.mubr.msk.f32.mxu0 %vm139_vm0, %v1382_v29 }
 0x838   :  { %2558 = vmatprep.mubr.msk.f32.mxu1 %vm139_vm0, %v1378_v31  ;;  %2567 = vmatmul.mubr.msk.f32.vlgmr.msra.gmra.mrb[20].mxu0 %vm139_vm0, %v1383_v28 }
 0x839   :  { %2559 = vmatmul.mubr.msk.f32.vlgmr.msra.gmra.mrb[10].mxu1 %vm139_vm0, %v1379_v30  ;;  %2569 = vmatprep.mubr.msk.f32.mxu0 %vm139_vm0, %v1384_v32 }
 0x83a   :  { %2561 = vmatprep.mubr.msk.f32.mxu1 %vm139_vm0, %v1380_v1  ;;  %v2555_v34 = vpop.f32.mrb[18].mxu0 }
 0x83b   :  { %v1375_v36 = vadd.f32 %v2555_v34, %v2305_v33  ;;  %v1369_v37 = vpop.f32.mrb[19].mxu0 }
 0x83c   :  { %2570 = vmatmul.mubr.msk.f32.gmra.mrb[22].mxu0 %vm139_vm0, %v1385_v0  ;;  %v1370_v38 = vadd.f32 %v2305_v33, %v1369_v37 }
 0x83d   :  { %2562 = vmatmul.mubr.msk.f32.gmra.mrb[12].mxu1 %vm139_vm0, %v1381_v35  ;;  %2580 = vmatprep.subr.mxu0 %v1375_v36 }
 0x83e   :  { %2572 = vmatprep.subr.mxu1 %v1370_v38  ;;  %2581 = vmatpush3.msra.mxu0 %v1375_v36 }
 0x83f   :  { %2573 = vmatpush3.msra.mxu1 %v1370_v38 }
 0x90b   :  { %v2568_v41 = vpop.f32.mrb[20].mxu0 }
 0x90c   :  { %v1573_v43 = vadd.f32 %v2568_v41, %v1105_v39  ;;  %v2560_v44 = vpop.f32.mrb[10].mxu1  ;;  %v1567_v45 = vpop.f32.mrb[21].mxu0 }
 0x90d   :  { %v1568_v47 = vadd.f32 %v1567_v45, %v1104_v40  ;;  %v1467_v48 = vpop.f32.mrb[11].mxu1  ;;  %v1473_v49 = vadd.f32 %v2560_v44, %v1101_v42 }
 0x90e   :  { %v1601_v50 = vsel %vm665_vm1, %v1573_v43, -inf  ;;  %v1468_v53 = vadd.f32 %v1467_v48, %v1100_v46 }
 0x90f   :  { %1602 = vmax.xlane.f32.xlu1 %v1601_v50  ;;  %v2571_v54 = vpop.f32.mrb[22].mxu0  ;;  %v1598_v55 = vsel %vm665_vm1, %v1568_v47, -inf  ;;  %v1589_v2 = vsel %vm665_vm1, %v1473_v49, -inf }
 0x910   :  { %v1577_v57 = vpop.f32.mrb[23].mxu0  ;;  %1599 = vmax.xlane.f32.xlu0 %v1598_v55  ;;  %v2563_v58 = vpop.f32.mrb[12].mxu1  ;;  %v1586_v5 = vsel %vm665_vm1, %v1468_v53, -inf  ;;  %v1583_v7 = vadd.f32 %v2571_v54, %v1107_v3 }
 0x911   :  { %v1477_v61 = vpop.f32.mrb[13].mxu1  ;;  %v1483_v63 = vadd.f32 %v2563_v58, %v1103_v56  ;;  %v1578_v9 = vadd.f32 %v1577_v57, %v1106_v6 }
 0x912   :  { %v1478_v4 = vadd.f32 %v1477_v61, %v1102_v59  ;;  %v1607_v11 = vsel %vm665_vm1, %v1583_v7, -inf }
 0x913   :  { %1590 = vmax.xlane.f32.xlu1 %v1589_v2  ;;  %v1595_v8 = vsel %vm665_vm1, %v1483_v63, -inf  ;;  %v1604_v12 = vsel %vm665_vm1, %v1578_v9, -inf }
 0x914   :  { %1587 = vmax.xlane.f32.xlu0 %v1586_v5  ;;  %v1592_v10 = vsel %vm665_vm1, %v1478_v4, -inf }
 0x917   :  { %1596 = vmax.xlane.f32.xlu1 %v1595_v8 }
 0x918   :  { %1593 = vmax.xlane.f32.xlu0 %v1592_v10 }
 0x91b   :  { %1608 = vmax.xlane.f32.xlu1 %v1607_v11 }
 0x91c   :  { %1605 = vmax.xlane.f32.xlu0 %v1604_v12 }
 0x99c   :  { %v1603_v13 = vpop.xlane.xlu1 %1602 }
 0x99d   :  { %v1615_v14 = vsub.f32 %v1573_v43, %v1603_v13  ;;  %v1600_v15 = vpop.xlane.xlu0 %1599 }
 0x99e   :  { %v1614_v16 = vsub.f32 %v1568_v47, %v1600_v15 }
 0x99f   :  { %v1628_v17 = vmul.f32 1.442695, %v1615_v14 }
 0x9a0   :  { %v1626_v18 = vmul.f32 1.442695, %v1614_v16  ;;  %v1591_v19 = vpop.xlane.xlu1 %1590 }
 0x9a1   :  { %2825 = vpow2.f32 %v1628_v17  ;;  %v1611_v20 = vsub.f32 %v1473_v49, %v1591_v19  ;;  %v1588_v21 = vpop.xlane.xlu0 %1587  ;;  %v1882_v19 = vld [vmem:[%s3396_s19] sm:$0xff] }
 0x9a2   :  { %2827 = vpow2.f32 %v1626_v18  ;;  %v1610_v22 = vsub.f32 %v1468_v53, %v1588_v21 }
 0x9a3   :  { %v1620_v23 = vmul.f32 1.442695, %v1611_v20  ;;  %v1883_v20 = vld [vmem:[%s3396_s19 + $0x8] sm:$0xff] }
 0x9a4   :  { %v1618_v24 = vmul.f32 1.442695, %v1610_v22  ;;  %v1597_v25 = vpop.xlane.xlu1 %1596  ;;  %v2701_v21 = vpack.c.bf16 %v1883_v20, %v1882_v19  ;;  %v1884_v22 = vld [vmem:[%s3396_s19 + $0x10] sm:$0xff]  ;;  %v2122_v20 = vld [vmem:[%s3072_s9 + $0x40] sm:$0xff] }
 0x9a5   :  { %2829 = vpow2.f32 %v1620_v23  ;;  %v1613_v28 = vsub.f32 %v1483_v63, %v1597_v25  ;;  %v1594_v29 = vpop.xlane.xlu0 %1593  ;;  %v1885_v23 = vld [vmem:[%s3396_s19 + $0x18] sm:$0xff] }
 0x9a6   :  { %2831 = vpow2.f32 %v1618_v24  ;;  %v1612_v30 = vsub.f32 %v1478_v4, %v1594_v29  ;;  %2702 = vmatprep.subr.bf16.mxu1 %v2701_v21  ;;  %v2705_v24 = vpack.c.bf16 %v1885_v23, %v1884_v22  ;;  %v2124_v23 = vld [vmem:[%s3072_s9 + $0x50] sm:$0xff] }
 0x9a7   :  { %v1624_v31 = vmul.f32 1.442695, %v1613_v28 }
 0x9a8   :  { %v1622_v32 = vmul.f32 1.442695, %v1612_v30  ;;  %v1609_v1 = vpop.xlane.xlu1 %1608 }
 0x9a9   :  { %2833 = vpow2.f32 %v1624_v31  ;;  %v1617_v33 = vsub.f32 %v1583_v7, %v1609_v1  ;;  %v1606_v0 = vpop.xlane.xlu0 %1605 }
 0x9aa   :  { %2835 = vpow2.f32 %v1622_v32  ;;  %v1616_v34 = vsub.f32 %v1578_v9, %v1606_v0 }
 0x9ab   :  { %v2826_v35 = vpop.eup %2825  ;;  %v1632_v36 = vmul.f32 1.442695, %v1617_v33 }
 0x9ac   :  { %v2828_v37 = vpop.eup %2827  ;;  %v1630_v38 = vmul.f32 1.442695, %v1616_v34  ;;  %v1649_v39 = vsel %vm665_vm1, %v2826_v35, 0.0 }
 0x9ad   :  { %2837 = vpow2.f32 %v1632_v36  ;;  %1650 = vadd.xlane.f32.xlu1 %v1649_v39  ;;  %v1646_v40 = vsel %vm665_vm1, %v2828_v37, 0.0 }
 0x9ae   :  { %2839 = vpow2.f32 %v1630_v38  ;;  %1647 = vadd.xlane.f32.xlu0 %v1646_v40 }
 0x9af   :  { %v2830_v41 = vpop.eup %2829 }
 0x9b0   :  { %v2832_v42 = vpop.eup %2831  ;;  %v1637_v43 = vsel %vm665_vm1, %v2830_v41, 0.0 }
 0x9b1   :  { %1638 = vadd.xlane.f32.xlu1 %v1637_v43  ;;  %v1634_v44 = vsel %vm665_vm1, %v2832_v42, 0.0 }
 0x9b2   :  { %1635 = vadd.xlane.f32.xlu0 %v1634_v44 }
 0x9b3   :  { %v2834_v45 = vpop.eup %2833 }
 0x9b4   :  { %v2836_v46 = vpop.eup %2835  ;;  %v1643_v47 = vsel %vm665_vm1, %v2834_v45, 0.0 }
 0x9b5   :  { %1644 = vadd.xlane.f32.xlu1 %v1643_v47  ;;  %v1640_v48 = vsel %vm665_vm1, %v2836_v46, 0.0 }
 0x9b6   :  { %1641 = vadd.xlane.f32.xlu0 %v1640_v48 }
 0x9b7   :  { %v2838_v49 = vpop.eup %2837 }
 0x9b8   :  { %v2840_v50 = vpop.eup %2839  ;;  %v1655_v53 = vsel %vm665_vm1, %v2838_v49, 0.0 }
 0x9b9   :  { %1656 = vadd.xlane.f32.xlu1 %v1655_v53  ;;  %v1652_v54 = vsel %vm665_vm1, %v2840_v50, 0.0 }
 0x9ba   :  { %1653 = vadd.xlane.f32.xlu0 %v1652_v54 }
 0xa3a   :  { %v1651_v55 = vpop.xlane.xlu1 %1650 }
 0xa3b   :  { %2841 = vrcp.f32 %v1651_v55  ;;  %v1648_v56 = vpop.xlane.xlu0 %1647 }
 0xa3c   :  { %2843 = vrcp.f32 %v1648_v56 }
 0xa3e   :  { %v1639_v57 = vpop.xlane.xlu1 %1638 }
 0xa3f   :  { %2845 = vrcp.f32 %v1639_v57  ;;  %v1636_v58 = vpop.xlane.xlu0 %1635 }
 0xa40   :  { %2847 = vrcp.f32 %v1636_v58 }
 0xa42   :  { %v1645_v59 = vpop.xlane.xlu1 %1644 }
 0xa43   :  { %2849 = vrcp.f32 %v1645_v59  ;;  %v1642_v61 = vpop.xlane.xlu0 %1641 }
 0xa44   :  { %2851 = vrcp.f32 %v1642_v61 }
 0xa45   :  { %v2842_v63 = vpop.eup %2841 }
 0xa46   :  { %v2844_v2 = vpop.eup %2843  ;;  %v1657_v3 = vpop.xlane.xlu1 %1656  ;;  %v1671_v6 = vmul.f32 %v2842_v63, %v2826_v35 }
 0xa47   :  { %2853 = vrcp.f32 %v1657_v3  ;;  %v1654_v4 = vpop.xlane.xlu0 %1653  ;;  %v1670_v5 = vmul.f32 %v2844_v2, %v2828_v37  ;;  %v2020_v2 = vld [vmem:[%s3398_s30] sm:$0xff]  ;;  %v2021_v3 = vld [vmem:[%s3398_s30 + $0x8] sm:$0xff] }
 0xa48   :  { %2855 = vrcp.f32 %v1654_v4  ;;  %v2709_v4 = vpack.c.bf16 %v2021_v3, %v2020_v2 }
 0xa49   :  { %v2846_v7 = vpop.eup %2845  ;;  %2582 = vmatprep.mubr.msk.f32.mxu0 %vm665_vm1, %v1670_v5  ;;  %v2022_v5 = vld [vmem:[%s3398_s30 + $0x10] sm:$0xff] }
 0xa4a   :  { %v2848_v8 = vpop.eup %2847  ;;  %2583 = vmatmul.mubr.msk.f32.vlgmr.msra.gmra.mrb[24].mxu0 %vm665_vm1, %v1671_v6  ;;  %v1667_v10 = vmul.f32 %v2846_v7, %v2830_v41  ;;  %v2023_v6 = vld [vmem:[%s3398_s30 + $0x18] sm:$0xff]  ;;  %2710 = vmatprep.subr.bf16.mxu0 %v2709_v4 }
 0xa4b   :  { %v1666_v9 = vmul.f32 %v2848_v8, %v2832_v42  ;;  %v2713_v7 = vpack.c.bf16 %v2023_v6, %v2022_v5  ;;  %2712 = vmatpush3.bf16.msra.mxu0 %v2709_v4  ;;  %v2114_v8 = vld [vmem:[%s3072_s9] sm:$0xff] }
 0xa4d   :  { %v2850_v11 = vpop.eup %2849  ;;  %2574 = vmatprep.mubr.msk.f32.mxu1 %vm665_vm1, %v1666_v9  ;;  %2714 = vmatprep.subr.bf16.mxu0 %v2713_v7  ;;  %v2115_v9 = vld [vmem:[%s3072_s9 + $0x8] sm:$0xff] }
 0xa4e   :  { %v2852_v12 = vpop.eup %2851  ;;  %2575 = vmatmul.mubr.msk.f32.vlgmr.msra.gmra.mrb[14].mxu1 %vm665_vm1, %v1667_v10  ;;  %v1669_v14 = vmul.f32 %v2850_v11, %v2834_v45  ;;  %v2326_v45 = vld [vmem:[%s3397_s24] ss:$0 sm:$0xff]  ;;  %v2116_v10 = vld [vmem:[%s3072_s9 + $0x10] sm:$0xff]  ;;  %v2717_v11 = vpack.c.bf16 %v2115_v9, %v2114_v8 }
 0xa4f   :  { %v1668_v13 = vmul.f32 %v2852_v12, %v2836_v46  ;;  %2704 = vmatpush3.bf16.msra.mxu1 %v2701_v21  ;;  %2716 = vmatpush3.bf16.msra.mxu0 %v2713_v7  ;;  %v2117_v12 = vld [vmem:[%s3072_s9 + $0x18] sm:$0xff]  ;;  %v2123_v21 = vld [vmem:[%s3072_s9 + $0x48] sm:$0xff] }
 0xa50   :  { %2706 = vmatprep.subr.bf16.mxu1 %v2705_v24  ;;  %v2733_v22 = vpack.c.bf16 %v2123_v21, %v2122_v20 }
 0xa51   :  { %v2854_v15 = vpop.eup %2853  ;;  %2577 = vmatprep.mubr.msk.f32.mxu1 %vm665_vm1, %v1668_v13  ;;  %v2721_v13 = vpack.c.bf16 %v2117_v12, %v2116_v10 }
 0xa52   :  { %v2856_v16 = vpop.eup %2855  ;;  %2578 = vmatmul.mubr.msk.f32.gmra.mrb[16].mxu1 %vm665_vm1, %v1669_v14  ;;  %v1673_v18 = vmul.f32 %v2854_v15, %v2838_v49  ;;  %v2118_v14 = vld [vmem:[%s3072_s9 + $0x20] sm:$0xff]  ;;  %v2119_v15 = vld [vmem:[%s3072_s9 + $0x28] sm:$0xff] }
 0xa53   :  { %v1672_v17 = vmul.f32 %v2856_v16, %v2840_v50  ;;  %2708 = vmatpush3.bf16.msra.mxu1 %v2705_v24  ;;  %v2725_v16 = vpack.c.bf16 %v2119_v15, %v2118_v14  ;;  %v2125_v24 = vld [vmem:[%s3072_s9 + $0x58] sm:$0xff] }
 0xa54   :  { %2718 = vmatprep.subr.bf16.mxu1 %v2717_v11 }
 0xa55   :  { %2585 = vmatprep.mubr.msk.f32.mxu0 %vm665_vm1, %v1672_v17  ;;  %v2120_v17 = vld [vmem:[%s3072_s9 + $0x30] sm:$0xff] }
 0xa56   :  { %2586 = vmatmul.mubr.msk.f32.gmra.mrb[26].mxu0 %vm665_vm1, %v1673_v18  ;;  %v2121_v18 = vld [vmem:[%s3072_s9 + $0x38] sm:$0xff] }
 0xa57   :  { %v2729_v19 = vpack.c.bf16 %v2121_v18, %v2120_v17 }
 0xb1d   :  { %v2584_v25 = vpop.f32.mrb[24].mxu0 }
 0xb1e   :  { %v1873_v28 = vmul.f32 %v2584_v25, %v3131_v60  ;;  %v1849_v29 = vpop.f32.mrb[25].mxu0  ;;  %v2737_v25 = vpack.c.bf16 %v2125_v24, %v2124_v23 }
 0xb1f   :  { %v1872_v30 = vmul.f32 %v1849_v29, %v3120_v51  ;;  %v2127_v29 = vld [vmem:[%s3072_s9 + $0x68] sm:$0xff] }
 0xb21   :  { %v1877_v31 = vadd.f32 %v1873_v28, %v1872_v30  ;;  %v2576_v32 = vpop.f32.mrb[14].mxu1  ;;  %v2126_v28 = vld [vmem:[%s3072_s9 + $0x60] sm:$0xff] }
 0xb22   :  { %v1869_v1 = vmul.f32 %v2576_v32, %v3131_v60  ;;  %v1752_v33 = vpop.f32.mrb[15].mxu1  ;;  %v2741_v30 = vpack.c.bf16 %v2127_v29, %v2126_v28 }
 0xb23   :  { %v1868_v0 = vmul.f32 %v1752_v33, %v3120_v51 }
 0xb25   :  { %v1876_v34 = vadd.f32 %v1869_v1, %v1868_v0  ;;  %v2579_v35 = vpop.f32.mrb[16].mxu1 }
 0xb26   :  { %v1762_v36 = vpop.f32.mrb[17].mxu1  ;;  %v1871_v38 = vmul.f32 %v2579_v35, %v3134_v62 }
 0xb27   :  { %v1870_v37 = vmul.f32 %v1762_v36, %v3123_v52  ;;  %v2329_v36 = vld [vmem:[%s3399_s6] ss:$0 sm:$0xff] }
 0xb29   :  { %v1878_v39 = vadd.f32 %v1876_v34, %v1870_v37  ;;  %v2587_v40 = vpop.f32.mrb[26].mxu0 }
 0xb2a   :  { %v1859_v41 = vpop.f32.mrb[27].mxu0  ;;  %v1875_v44 = vmul.f32 %v2587_v40, %v3134_v62 }
 0xb2b   :  { %v1880_v42 = vadd.f32 %v1878_v39, %v1871_v38  ;;  %v1874_v43 = vmul.f32 %v1859_v41, %v3123_v52  ;;  %v2330_v41 = vld [vmem:[%s3400_s12] ss:$0 sm:$0xff] }
 0xb2d   :  { %v1879_v60 = vadd.f32 %v1877_v31, %v1874_v43  ;;  %2596 = vmatprep.mubr.msk.f32.mxu1 %vm139_vm0, %v1880_v42 }
 0xb2f   :  { %v1881_v51 = vadd.f32 %v1879_v60, %v1875_v44  ;;  %v2128_v60 = vld [vmem:[%s3072_s9 + $0x70] sm:$0xff] }
 0xb31   :  { %2597 = vmatmul.mubr.msk.f32.vlgmr.msra.gmra.mrb[18].mxu1 %vm139_vm0, %v1881_v51  ;;  %v2129_v51 = vld [vmem:[%s3072_s9 + $0x78] sm:$0xff]  ;;  %s2861_s9 = scalar_lea.vmem %s2224_s22, 256 }
 0xb32   :  { %2720 = vmatpush3.bf16.msra.mxu1 %v2717_v11  ;;  %p2862_p0 = scmp.ne.s32.totalorder %s2224_s22, %s2861_s9  ;;  %p2867_p2 = scmp.lt.s32.totalorder %s2861_s9, %s2861_s9 }
 0xb33   :  { %2722 = vmatprep.subr.bf16.mxu1 %v2721_v13 }
 0xb34   :  { %p2868_p3 = por %p2867_p2, %p2866_p1 }
 0xb36   :  { %2724 = vmatpush3.bf16.msra.mxu1 %v2721_v13  ;;  %p2869_p4 = pnand %p2868_p3, %p2862_p0 }
 0xb37   :  { %2726 = vmatprep.subr.bf16.mxu1 %v2725_v16 }
 0xb3a   :  { %2728 = vmatpush3.bf16.msra.mxu1 %v2725_v16 }
 0xb3b   :  { %2730 = vmatprep.subr.bf16.mxu1 %v2729_v19 }
 0xb3e   :  { %2732 = vmatpush3.bf16.msra.mxu1 %v2729_v19 }
 0xb3f   :  { %2734 = vmatprep.subr.bf16.mxu1 %v2733_v22 }
 0xb42   :  { %2736 = vmatpush3.bf16.msra.mxu1 %v2733_v22 }
 0xb43   :  { %2738 = vmatprep.subr.bf16.mxu1 %v2737_v25 }
 0xb46   :  { %2740 = vmatpush3.bf16.msra.mxu1 %v2737_v25 }
 0xb47   :  { %2742 = vmatprep.subr.bf16.mxu1 %v2741_v30 }
 0xb4a   :  { %2744 = vmatpush3.bf16.msra.mxu1 %v2741_v30 }
 0xc04   :  { %v2598_v46 = vpop.f32.mrb[18].mxu1 }
 0xc05   :  { %v1971_v47 = vadd.f32 %v2598_v46, %v2326_v45  ;;  %v1965_v48 = vpop.f32.mrb[19].mxu1  ;;  %v2331_v46 = vld [vmem:[%s3067_s27] ss:$0 sm:$0xff] }
 0xc06   :  { %v1966_v49 = vadd.f32 %v2326_v45, %v1965_v48  ;;  %v2745_v45 = vpack.c.bf16 %v2129_v51, %v2128_v60 }
 0xc07   :  { %v3309_v50 = vadd.f32 %v1971_v47, %v3203_v26 }
 0xc08   :  { %v3312_v53 = vadd.f32 %v1966_v49, %v3206_v27  ;;  %2746 = vmatprep.subr.bf16.mxu1 %v2745_v45 }
 0xc09   :  { %v1979_v52 = vsel %vm139_vm0, %v3309_v50, 0.0  ;;  %2748 = vmatpush3.bf16.msra.mxu1 %v2745_v45 }
 0xc0a   :  { %1980 = vadd.xlane.f32.xlu1 %v1979_v52  ;;  %v1976_v62 = vsel %vm139_vm0, %v3312_v53, 0.0 }
 0xc0b   :  { %1977 = vadd.xlane.f32.xlu0 %v1976_v62 }
 0xc97   :  { %v1981_v54 = vpop.xlane.xlu1 %1980 }
 0xc98   :  { %v1983_v55 = vmul.f32 0.03125, %v1981_v54  ;;  %v1978_v56 = vpop.xlane.xlu0 %1977 }
 0xc99   :  { %v1982_v26 = vmul.f32 0.03125, %v1978_v56  ;;  %v2334_v56 = vld [vmem:[%s3077_s17] ss:$0 sm:$0xff] }
 0xc9a   :  { %v3319_v57 = vsub.f32 %v3309_v50, %v1983_v55 }
 0xc9b   :  { %v3322_v27 = vsub.f32 %v3312_v53, %v1982_v26 }
 0xc9c   :  { %v1987_v58 = vmul.f32 %v3319_v57, %v3319_v57 }
 0xc9d   :  { %v1986_v59 = vmul.f32 %v3322_v27, %v3322_v27 }
 0xc9e   :  { %v1991_v61 = vsel %vm139_vm0, %v1987_v58, 0.0 }
 0xc9f   :  { %1992 = vadd.xlane.f32.xlu1 %v1991_v61  ;;  %v1988_v63 = vsel %vm139_vm0, %v1986_v59, 0.0 }
 0xca0   :  { %1989 = vadd.xlane.f32.xlu0 %v1988_v63 }
 0xd2c   :  { %v1993_v31 = vpop.xlane.xlu1 %1992 }
 0xd2d   :  { %v1995_v32 = vmul.f32 0.03125, %v1993_v31  ;;  %v1990_v1 = vpop.xlane.xlu0 %1989 }
 0xd2e   :  { %v1994_v33 = vmul.f32 0.03125, %v1990_v1 }
 0xd2f   :  { %v1997_v0 = vadd.f32 1e-06, %v1995_v32 }
 0xd30   :  { %v1996_v34 = vadd.f32 1e-06, %v1994_v33 }
 0xd31   :  { %2857 = vrsqrt.f32 %v1997_v0 }
 0xd32   :  { %2859 = vrsqrt.f32 %v1996_v34 }
 0xd3b   :  { %v2858_v35 = vpop.eup %2857 }
 0xd3c   :  { %v2860_v37 = vpop.eup %2859  ;;  %v2001_v38 = vmul.f32 %v2858_v35, %v3319_v57 }
 0xd3d   :  { %v2000_v39 = vmul.f32 %v2860_v37, %v3322_v27 }
 0xd3e   :  { %v2010_v40 = vmul.f32 %v2329_v36, %v2001_v38 }
 0xd3f   :  { %v2009_v42 = vmul.f32 %v2329_v36, %v2000_v39 }
 0xd40   :  { %v2019_v44 = vadd.f32 %v2330_v41, %v2010_v40 }
 0xd41   :  { %v2018_v43 = vadd.f32 %v2330_v41, %v2009_v42 }
 0xd43   :  { %2607 = vmatprep.mubr.msk.f32.mxu0 %vm139_vm0, %v2018_v43 }
 0xd44   :  { %2608 = vmatmul.mubr.msk.f32.vlgmr.msra.gmra.mrb[28].mxu0 %vm139_vm0, %v2019_v44 }
 0xe17   :  { %v2609_v47 = vpop.f32.mrb[28].mxu0 }
 0xe18   :  { %v2109_v48 = vadd.f32 %v2609_v47, %v2331_v46  ;;  %v2103_v49 = vpop.f32.mrb[29].mxu0 }
 0xe19   :  { %v2104_v52 = vadd.f32 %v2331_v46, %v2103_v49 }
 0xe1a   :  { %v2113_v54 = vmax.f32 %v2109_v48, 0.0 }
 0xe1b   :  { %v2112_v62 = vmax.f32 %v2104_v52, 0.0 }
 0xe1d   :  { %2642 = vmatprep.mubr.f32.mxu1 %v2112_v62 }
 0xe1e   :  { %2643 = vmatmul.mubr.f32.vlgmr.msra.gmra.mrb[20].mxu1 %v2113_v54 }
 0xef1   :  { %v2644_v55 = vpop.f32.mrb[20].mxu1 }
 0xef2   :  { %v2206_v26 = vadd.f32 %v2644_v55, %v3309_v50  ;;  %v2196_v57 = vpop.f32.mrb[21].mxu1 }
 0xef3   :  { %v2205_v27 = vadd.f32 %v2196_v57, %v3312_v53 }
 0xef4   :  { %v2215_v58 = vadd.f32 %v2334_v56, %v2206_v26 }
 0xef5   :  { %v2214_v59 = vadd.f32 %v2334_v56, %v2205_v27 }
 0xef6   :  { %2217 = vst.msk [vmem:[#allocation2 + $0x8] sm:$0xff] %vm139_vm0, %v2215_v58 }
 0xef7   :  { %2216 = vst.msk [vmem:[#allocation2] sm:$0xff] %vm139_vm0, %v2214_v59 }
 0xef8   :  { %2872 = shalt.err (!%p2869_p4)
}
 0xef9   :  { %s2873_s17 = scalar_lea.hbm %s3082_s4, 256 }
 0xefa   :  { %p2874_p5 = scmp.ne.s32.totalorder %s3082_s4, %s2873_s17  ;;  %p2877_p6 = scmp.lt.u32.totalorder %s2873_s17, %s3082_s4 }
 0xefc   :  { %p2879_p7 = pnand %p2877_p6, %p2874_p5 }
 0xefe   :  { %2882 = shalt.err (!%p2879_p7)
}
 0xeff   :  { %s2917_s27 = smov 128   ;;  %s2918_s23 = smov 8  }
 0xf00   :  { %2229 = dma.vmem_to_hbm [thread:$0]  %s2224_s22, 256, %s3082_s4, [#allocation3], %s2917_s27, %s2917_s27, %s2918_s23  }
 0xf01   :  { %2883 = dma.done.wait [#allocation3], 256  }
 0xf02   :  { %2884 = vsyncadd [#allocation3], 4294967040 }
 0xf03   :  { %2233 = vsyncpa [#allocation3], 1 }

</bundles_post_ra>
